<compile_context>
chip_gen: v7x
topology: tpu7x:2x2x1
jax: 0.10.0
libtpu: 0.0.40
codegen_flags: <defaults>
</compile_context>

<pallas_src>
import math
import functools

import jax
import jax.numpy as jnp
from jax import lax
from jax.experimental import pallas as pl
from jax.experimental.pallas import tpu as pltpu

F32 = jnp.float32
_EPS = 1e-5                      # torch.nn.InstanceNorm1d default eps
_VMEM_LIMIT = 50 * 1024 * 1024   # above the 16/32 MiB scoped defaults, below v7x's 64 MiB physical
_VMEM_WORKSET = 32 * 1024 * 1024  # budget used to size the per-step batch block


def _pick_batch_block(B, per_item_bytes, vmem_budget=_VMEM_WORKSET, min_steps=2):
    """Largest divisor of B whose per-step working set fits the VMEM budget, capped so the
    batch ("parallel") grid axis has at least `min_steps` steps (v7x has 2 TensorCores)."""
    cap = B if B < min_steps else max(1, B // min_steps)
    best = 1
    for d in range(1, cap + 1):
        if B % d == 0 and d * per_item_bytes <= vmem_budget:
            best = d
    return best


def _enc_item_bytes(N, E, FF):
    # rough f32 per-batch-element working set: double-buffered IO blocks + live temporaries
    io = 2 * (N * 2 + N * N) + 2 * (E * N + 2 * N * E + E)
    act = 10 * N * E + N * N + N * FF + 3 * N * E
    return 4 * (io + act)


def _dec_item_bytes(N, E, P):
    io = 2 * (2 * N * E + E * N + E + P + 3 * P * N)
    act = P * (5 * E + 4 * N) + 2 * N * E
    return 4 * (io + act)


# ----------------------------------------------------------------------------
# Kernel 1: embedding + encoder layer (per grid step) + fused decoder set_kv
# ----------------------------------------------------------------------------
def _encoder_step_kernel(log_scale,
                         alphas_ref,                 # SMEM (L,) per-layer AFT_dist_alpha
                         prob_ref, nd_ref,           # (Bb,N,2), (Bb,N,N)
                         we_ref, be_ref,             # (2,E), (1,E) embedding
                         wqkv_ref,                   # (1,E,3E)  [Wq | Wk | Wv]
                         norms_ref,                  # (1,4,E)   [n1w, n1b, n2w, n2b]
                         w1_ref, b1_ref,             # (1,E,FF), (1,1,FF)
                         w2_ref, b2_ref,             # (1,FF,E), (1,1,E)
                         dwkv_ref,                   # (E,2E)    [dec Wk | dec Wv]
                         enct_ref, ekv_ref, mean_ref,
                         x_scr):                     # VMEM (Bb,N,E) layer-carried activation
    li = pl.program_id(1)
    n_layers = pl.num_programs(1)
    Bb, N, E = x_scr.shape

    # ---- first layer step: embedding Linear(2->E) as two VPU FMAs (no K=2 MXU matmul) ----
    @pl.when(li == 0)
    def _():
        prob = prob_ref[...]
        x_scr[...] = (prob[..., 0:1] * we_ref[0:1, :]
                      + prob[..., 1:2] * we_ref[1:2, :]
                      + be_ref[...])

    x = x_scr[...]
    x2 = x.reshape(Bb * N, E)

    # ---- fused Q/K/V projection: one (Bb*N, E) x (E, 3E) MXU pass ----
    qkv = jnp.dot(x2, wqkv_ref[0], preferred_element_type=F32).reshape(Bb, N, 3 * E)
    q = qkv[..., 0 * E:1 * E]
    k = qkv[..., 1 * E:2 * E]
    v = qkv[..., 2 * E:3 * E]

    # ---- AFT attention with shift-invariant exp (replaces the nan_to_num fallback) ----
    adbs = (log_scale * alphas_ref[li]) * nd_ref[...]                   # (Bb,N,N)
    e_a = jnp.exp(adbs - jnp.max(adbs, axis=-1, keepdims=True))
    e_k = jnp.exp(k - jnp.max(k, axis=1, keepdims=True))
    rhs = jnp.concatenate([e_k * v, e_k], axis=-1)                      # (Bb,N,2E)
    agg = jnp.einsum('bnm,bmf->bnf', e_a, rhs, preferred_element_type=F32)
    weighted = agg[..., :E] / agg[..., E:]                              # bias / denom (exact)
    out = jax.nn.sigmoid(q) * weighted

    nrm = norms_ref[0]                                                  # (4,E)

    # ---- Add & InstanceNorm1d #1 (normalize over node axis, single-pass variance) ----
    a1 = x + out
    mu1 = jnp.mean(a1, axis=1, keepdims=True)
    var1 = jnp.mean(a1 * a1, axis=1, keepdims=True) - mu1 * mu1
    out1 = (a1 - mu1) * lax.rsqrt(var1 + _EPS) * nrm[0:1] + nrm[1:2]

    # ---- Feed-forward ----
    h = jnp.maximum(
        jnp.dot(out1.reshape(Bb * N, E), w1_ref[0], preferred_element_type=F32) + b1_ref[0],
        0.0)
    out2 = (jnp.dot(h, w2_ref[0], preferred_element_type=F32) + b2_ref[0]).reshape(Bb, N, E)

    # ---- Add & InstanceNorm1d #2 ----
    a2 = out1 + out2
    mu2 = jnp.mean(a2, axis=1, keepdims=True)
    var2 = jnp.mean(a2 * a2, axis=1, keepdims=True) - mu2 * mu2
    x_new = (a2 - mu2) * lax.rsqrt(var2 + _EPS) * nrm[2:3] + nrm[3:4]

    x_scr[...] = x_new

    # ---- last layer: decoder.set_kv cache + single_head_key + graph mean, fused here ----
    @pl.when(li == n_layers - 1)
    def _():
        xf = x_scr[...]
        kv = jnp.dot(xf.reshape(Bb * N, E), dwkv_ref[...],
                     preferred_element_type=F32).reshape(Bb, N, 2 * E)
        dk = kv[..., :E]
        dv = kv[..., E:]
        e_dk = jnp.exp(dk - jnp.max(dk, axis=1, keepdims=True))        # shift-invariant cache
        ekv_ref[...] = jnp.concatenate([e_dk * dv, e_dk], axis=-1)     # decoder consumes as-is
        for i in range(Bb):                                            # 2-D XLU transposes
            enct_ref[i] = xf[i].T                                      # single_head_key (E,N)
        mean_ref[...] = jnp.mean(xf, axis=1, keepdims=True)            # encoded_graph_mean


def encoder_fused_call(problems, neg_dist, params, log_scale, batch_block=None):
    B, N, _ = problems.shape
    E = params["w_emb"].shape[1]
    L = params["wqkv_s"].shape[0]
    FF = params["w1_s"].shape[2]
    Bb = batch_block or _pick_batch_block(B, _enc_item_bytes(N, E, FF))

    kernel = functools.partial(_encoder_step_kernel, float(log_scale))

    def act(shape):
        return pl.BlockSpec(shape, lambda b, l: (b, 0, 0))

    def layer3(shape):
        return pl.BlockSpec(shape, lambda b, l: (l, 0, 0))

    def const2(shape):
        return pl.BlockSpec(shape, lambda b, l: (0, 0))

    out_shapes = (
        jax.ShapeDtypeStruct((B, E, N), F32),        # single_head_key = encoded_nodes^T
        jax.ShapeDtypeStruct((B, N, 2 * E), F32),    # [exp(k)*v | exp(k)] decoder cache
        jax.ShapeDtypeStruct((B, 1, E), F32),        # encoded_graph_mean
    )
    out_specs = (act((Bb, E, N)), act((Bb, N, 2 * E)), act((Bb, 1, E)))

    return pl.pallas_call(
        kernel,
        out_shape=out_shapes,
        grid=(B // Bb, L),
        in_specs=[
            pl.BlockSpec(memory_space=pltpu.MemorySpace.SMEM),   # per-layer AFT_dist_alpha (L,)
            act((Bb, N, 2)),                                     # problems
            act((Bb, N, N)),                                     # negative_dist
            const2((2, E)), const2((1, E)),                      # embedding W, b
            layer3((1, E, 3 * E)),                               # [Wq|Wk|Wv] for layer l
            layer3((1, 4, E)),                                   # norm1/norm2 affine params
            layer3((1, E, FF)), layer3((1, 1, FF)),              # FF W1, b1
            layer3((1, FF, E)), layer3((1, 1, E)),               # FF W2, b2
            const2((E, 2 * E)),                                  # decoder [Wk|Wv] (set_kv)
        ],
        out_specs=out_specs,
        scratch_shapes=[pltpu.VMEM((Bb, N, E), F32)],
        compiler_params=pltpu.CompilerParams(
            dimension_semantics=("parallel", "arbitrary"),
            vmem_limit_bytes=_VMEM_LIMIT),
    )(params["alphas"], problems, neg_dist,
      params["w_emb"], params["b_emb"],
      params["wqkv_s"], params["norms_s"],
      params["w1_s"], params["b1_s"], params["w2_s"], params["b2_s"],
      params["dec_wkv"])


# ----------------------------------------------------------------------------
# Kernel 2: KP_Decoder.forward -> probs (uses cached exp(k)/exp(k)*v, enc^T, mean)
# ----------------------------------------------------------------------------
def _decoder_kernel(log_scale, inv_sqrt_emb, logit_clip,
                    alphas_ref,                 # SMEM (2,) [AFT_dist_alpha, probs_dist_alpha]
                    ekv_ref,                    # (Bb, N, 2E) cached [exp(k)*v | exp(k)]
                    enct_ref,                   # (Bb, E, N)  single_head_key
                    mean_ref,                   # (Bb, 1, E)  encoded_graph_mean
                    cap_ref,                    # (Bb, 1, P)  capacity (lane-dense)
                    cd_ref, mask_ref,           # (Bb, P, N)
                    wqm_ref, wqc_ref,           # (E, E), (1, E)  split Wq_last
                    probs_ref):                 # (Bb, P, N)
    Bb, P, N = cd_ref.shape
    E = mean_ref.shape[2]

    aft_alpha = alphas_ref[0]
    probs_alpha = alphas_ref[1]
    cur_dist = cd_ref[...]
    mask = mask_ref[...]

    # q = Wq_last([graph_mean, capacity]); graph-mean part computed once per batch element.
    q_mean = jnp.dot(mean_ref[...].reshape(Bb, E), wqm_ref[...],
                     preferred_element_type=F32)                        # (Bb, E)
    cap = cap_ref[...][:, 0, :]                                         # (Bb, P)
    q = q_mean[:, None, :] + cap[:, :, None] * wqc_ref[...]             # (Bb, P, E)
    sig_q = jax.nn.sigmoid(q)

    adbs = (log_scale * aft_alpha) * cur_dist + mask                    # (Bb, P, N)
    mx = jnp.maximum(jnp.max(adbs, axis=-1, keepdims=True), -1e30)      # guard all-masked rows
    e_a = jnp.exp(adbs - mx)

    # bias and denom share one MXU pass against the cached (N, 2E) slab
    agg = jnp.einsum('bpn,bnf->bpf', e_a, ekv_ref[...], preferred_element_type=F32)
    weighted = agg[..., :E] / agg[..., E:]
    aft_out = sig_q * weighted                                          # (Bb, P, E)

    score = jnp.einsum('bpe,ben->bpn', aft_out, enct_ref[...], preferred_element_type=F32)
    score_scaled = score * inv_sqrt_emb + (log_scale * probs_alpha) * cur_dist
    score_masked = logit_clip * jnp.tanh(score_scaled) + mask

    m = jnp.max(score_masked, axis=-1, keepdims=True)
    e = jnp.exp(score_masked - m)
    probs_ref[...] = e / jnp.sum(e, axis=-1, keepdims=True)


def decoder_call(ekv, enc_t, mean, capacity, cur_dist, ninf_mask, dec_params,
                 log_scale, sqrt_embedding_dim, logit_clipping, batch_block=None):
    B, N, E2 = ekv.shape
    E = E2 // 2
    P = capacity.shape[1]
    Bb = batch_block or _pick_batch_block(B, _dec_item_bytes(N, E, P))
    cap3 = capacity.reshape(B, 1, P)                 # lane-dense capacity layout

    kernel = functools.partial(_decoder_kernel, float(log_scale),
                               1.0 / float(sqrt_embedding_dim), float(logit_clipping))

    def act(shape):
        return pl.BlockSpec(shape, lambda b: (b, 0, 0))

    return pl.pallas_call(
        kernel,
        out_shape=jax.ShapeDtypeStruct((B, P, N), F32),
        grid=(B // Bb,),
        in_specs=[
            pl.BlockSpec(memory_space=pltpu.MemorySpace.SMEM),   # [AFT_dist_alpha, probs_dist_alpha]
            act((Bb, N, 2 * E)),                                 # cached [exp(k)*v | exp(k)]
            act((Bb, E, N)),                                     # single_head_key
            act((Bb, 1, E)),                                     # encoded_graph_mean
            act((Bb, 1, P)),                                     # capacity
            act((Bb, P, N)),                                     # cur_dist
            act((Bb, P, N)),                                     # ninf_mask
            pl.BlockSpec((E, E), lambda b: (0, 0)),              # Wq_last (graph-mean part)
            pl.BlockSpec((1, E), lambda b: (0, 0)),              # Wq_last (capacity part)
        ],
        out_specs=act((Bb, P, N)),
        compiler_params=pltpu.CompilerParams(
            dimension_semantics=("parallel",),
            vmem_limit_bytes=_VMEM_LIMIT),
    )(dec_params["alphas"], ekv, enc_t, mean, cap3, cur_dist, ninf_mask,
      dec_params["wq_mean"], dec_params["wq_cap"])


# ----------------------------------------------------------------------------
# Parameter construction (deterministic, mimics nn.Linear default init shapes).
# Weights stored transposed (in_dim, out_dim); per-layer weights stacked on dim 0.
# ----------------------------------------------------------------------------
def _linear_t(key, in_dim, out_dim, bias=True):
    bound = 1.0 / math.sqrt(in_dim)
    kw, kb = jax.random.split(key)
    w = jax.random.uniform(kw, (in_dim, out_dim), F32, -bound, bound)
    if bias:
        b = jax.random.uniform(kb, (1, out_dim), F32, -bound, bound)
        return w, b
    return w


def build_params(key, E, FF, num_layers, alpha_default):
    keys = jax.random.split(key, 2 + num_layers)
    w_emb, b_emb = _linear_t(keys[0], 2, E)

    wqkv_l, w1_l, b1_l, w2_l, b2_l = [], [], [], [], []
    for li in range(num_layers):
        lk = jax.random.split(keys[1 + li], 5)
        wq = _linear_t(lk[0], E, E, bias=False)
        wk = _linear_t(lk[1], E, E, bias=False)
        wv = _linear_t(lk[2], E, E, bias=False)
        wqkv_l.append(jnp.concatenate([wq, wk, wv], axis=1))      # (E, 3E)
        w1, b1 = _linear_t(lk[3], E, FF)
        w2, b2 = _linear_t(lk[4], FF, E)
        w1_l.append(w1); b1_l.append(b1)
        w2_l.append(w2); b2_l.append(b2)

    # InstanceNorm1d(affine=True) init: weight=1, bias=0; rows = [n1w, n1b, n2w, n2b]
    norms = jnp.tile(
        jnp.stack([jnp.ones((E,), F32), jnp.zeros((E,), F32),
                   jnp.ones((E,), F32), jnp.zeros((E,), F32)])[None],
        (num_layers, 1, 1))                                       # (L, 4, E)

    dk = jax.random.split(keys[1 + num_layers], 3)
    wq_last = _linear_t(dk[0], E + 1, E, bias=False)              # (E+1, E) pre-transposed
    dec_wk = _linear_t(dk[1], E, E, bias=False)
    dec_wv = _linear_t(dk[2], E, E, bias=False)

    return dict(
        w_emb=w_emb, b_emb=b_emb,
        wqkv_s=jnp.stack(wqkv_l),                                 # (L, E, 3E)
        norms_s=norms,                                            # (L, 4, E)
        w1_s=jnp.stack(w1_l), b1_s=jnp.stack(b1_l),               # (L, E, FF), (L, 1, FF)
        w2_s=jnp.stack(w2_l), b2_s=jnp.stack(b2_l),               # (L, FF, E), (L, 1, E)
        alphas=jnp.full((num_layers,), alpha_default, F32),       # per-layer AFT_dist_alpha
        dec_wkv=jnp.concatenate([dec_wk, dec_wv], axis=1),        # (E, 2E)
        dec=dict(
            wq_mean=wq_last[:E, :],                               # (E, E)
            wq_cap=wq_last[E:E + 1, :],                           # (1, E)
            alphas=jnp.array([alpha_default, alpha_default], F32),
        ),
    )


# ----------------------------------------------------------------------------
# KPModel: pre_forward + forward (eval / argmax path)
# ----------------------------------------------------------------------------
def kp_model_pre_forward(params, problems, dist_full, log_scale):
    dist = dist_full[:, :-1, :]                    # reset_state.dist[:, :-1, :]
    enc_t, ekv, mean = encoder_fused_call(problems, dist, params, log_scale)
    return dict(enc_t=enc_t, ekv=ekv, mean=mean)


def kp_model_forward(params, cache, capacity, cur_dist, ninf_mask,
                     log_scale, sqrt_embedding_dim, logit_clipping):
    probs = decoder_call(cache["ekv"], cache["enc_t"], cache["mean"],
                         capacity, cur_dist, ninf_mask, params["dec"],
                         log_scale, sqrt_embedding_dim, logit_clipping)
    # eval_type == 'argmax' path (deterministic).
    # TODO(synk): the training / 'softmax' path uses torch.multinomial with a
    #             `(prob != 0).all()` retry loop; stochastic resampling is not reproduced.
    selected = jnp.argmax(probs, axis=2)
    prob = None
    return selected, prob, probs


# ----------------------------------------------------------------------------
if __name__ == "__main__":
    B, N, P = 4, 16, 16
    E, FF, L = 128, 256, 2        # lane-dense (multiples of 128) embedding / FF widths
    alpha_default = 0.1
    sqrt_embedding_dim = math.sqrt(E)
    logit_clipping = 10.0
    log_scale = math.log2(N)

    key = jax.random.PRNGKey(0)
    k_par, k_prob, k_dist, k_cap, k_cd = jax.random.split(key, 5)

    params = build_params(k_par, E, FF, L, alpha_default)

    problems = jax.random.uniform(k_prob, (B, N, 2), F32)           # reset_state.problems
    dist_full = -jax.random.uniform(k_dist, (B, N + 1, N), F32)     # reset_state.dist
    capacity = jax.random.uniform(k_cap, (B, P), F32) * 2.0 + 1.0   # state.capacity
    cur_dist = -jax.random.uniform(k_cd, (B, P, N), F32)            # cur_dist

    ninf_mask = jnp.zeros((B, P, N), F32)
    ninf_mask = ninf_mask.at[:, :, 0].set(-jnp.inf)                 # mask one item

    cache = kp_model_pre_forward(params, problems, dist_full, log_scale)
    selected, prob, probs = kp_model_forward(
        params, cache, capacity, cur_dist, ninf_mask,
        log_scale, sqrt_embedding_dim, logit_clipping)

    selected = jax.block_until_ready(selected)
    probs = jax.block_until_ready(probs)

    assert selected.shape == (B, P)
    assert probs.shape == (B, P, N)
    assert bool(jnp.all(jnp.isfinite(probs)))
    assert bool(jnp.allclose(jnp.sum(probs, axis=-1), 1.0, atol=1e-4))
    assert bool(jnp.all(probs[:, :, 0] == 0.0))     # masked item has zero probability

    print("KERNEL_OK")
</pallas_src>

<mosaic_0001>
module attributes {stable_mosaic.version = 11 : i64} {
  func.func @_encoder_step_kernel(%arg0: i32, %arg1: i32, %arg2: memref<2xf32, #tpu.memory_space<smem>>, %arg3: memref<2x16x2xf32, #tpu.memory_space<vmem>>, %arg4: memref<2x16x16xf32, #tpu.memory_space<vmem>>, %arg5: memref<2x128xf32, #tpu.memory_space<vmem>>, %arg6: memref<1x128xf32, #tpu.memory_space<vmem>>, %arg7: memref<1x128x384xf32, #tpu.memory_space<vmem>>, %arg8: memref<1x4x128xf32, #tpu.memory_space<vmem>>, %arg9: memref<1x128x256xf32, #tpu.memory_space<vmem>>, %arg10: memref<1x1x256xf32, #tpu.memory_space<vmem>>, %arg11: memref<1x256x128xf32, #tpu.memory_space<vmem>>, %arg12: memref<1x1x128xf32, #tpu.memory_space<vmem>>, %arg13: memref<128x256xf32, #tpu.memory_space<vmem>>, %arg14: memref<2x128x16xf32, #tpu.memory_space<vmem>>, %arg15: memref<2x16x256xf32, #tpu.memory_space<vmem>>, %arg16: memref<2x1x128xf32, #tpu.memory_space<vmem>>, %arg17: memref<2x16x128xf32, #tpu.memory_space<vmem>>) attributes {dimension_semantics = [#tpu.dimension_semantics<parallel>, #tpu.dimension_semantics<arbitrary>], iteration_bounds = array<i64: 2, 2>, scalar_prefetch = 0 : i64, scratch_operands = 1 : i64, tpu.core_type = #tpu.core_type<tc>, window_params = [{transform_indices = @transform_0, window_bounds = array<i64: 2>}, {transform_indices = @transform_1, window_bounds = array<i64: 2, 16, 2>}, {transform_indices = @transform_2, window_bounds = array<i64: 2, 16, 16>}, {pipeline_mode = #tpu.pipeline_mode<synchronous>, transform_indices = @transform_3, window_bounds = array<i64: 2, 128>}, {pipeline_mode = #tpu.pipeline_mode<synchronous>, transform_indices = @transform_4, window_bounds = array<i64: 1, 128>}, {transform_indices = @transform_5, window_bounds = array<i64: 1, 128, 384>}, {transform_indices = @transform_6, window_bounds = array<i64: 1, 4, 128>}, {transform_indices = @transform_7, window_bounds = array<i64: 1, 128, 256>}, {transform_indices = @transform_8, window_bounds = array<i64: 1, 1, 256>}, {transform_indices = @transform_9, window_bounds = array<i64: 1, 256, 128>}, {transform_indices = @transform_10, window_bounds = array<i64: 1, 1, 128>}, {pipeline_mode = #tpu.pipeline_mode<synchronous>, transform_indices = @transform_11, window_bounds = array<i64: 128, 256>}, {transform_indices = @transform_12, window_bounds = array<i64: 2, 128, 16>}, {transform_indices = @transform_13, window_bounds = array<i64: 2, 16, 256>}, {transform_indices = @transform_14, window_bounds = array<i64: 2, 1, 128>}]} {
    %c0_i32 = arith.constant 0 : i32
    %0 = arith.cmpi eq, %arg1, %c0_i32 : i32
    %1 = arith.extui %0 : i1 to i32
    %c0_i32_0 = arith.constant 0 : i32
    %2 = arith.cmpi ne, %1, %c0_i32_0 : i32
    scf.if %2 {
      %c0_46 = arith.constant 0 : index
      %c0_47 = arith.constant 0 : index
      %c0_48 = arith.constant 0 : index
      %118 = vector.load %arg3[%c0_46, %c0_47, %c0_48] : memref<2x16x2xf32, #tpu.memory_space<vmem>>, vector<2x16x2xf32>
      %119 = vector.extract_strided_slice %118 {offsets = [0, 0, 0], sizes = [2, 16, 1], strides = [1, 1, 1]} : vector<2x16x2xf32> to vector<2x16x1xf32>
      %c0_49 = arith.constant 0 : index
      %c0_50 = arith.constant 0 : index
      %120 = vector.load %arg5[%c0_49, %c0_50] : memref<2x128xf32, #tpu.memory_space<vmem>>, vector<1x128xf32>
      %121 = vector.shape_cast %120 : vector<1x128xf32> to vector<1x1x128xf32>
      %122 = vector.broadcast %119 : vector<2x16x1xf32> to vector<2x16x128xf32>
      %123 = vector.broadcast %121 : vector<1x1x128xf32> to vector<2x16x128xf32>
      %124 = arith.mulf %122, %123 : vector<2x16x128xf32>
      %125 = vector.extract_strided_slice %118 {offsets = [0, 0, 1], sizes = [2, 16, 1], strides = [1, 1, 1]} : vector<2x16x2xf32> to vector<2x16x1xf32>
      %c1 = arith.constant 1 : index
      %c0_51 = arith.constant 0 : index
      %126 = vector.load %arg5[%c1, %c0_51] : memref<2x128xf32, #tpu.memory_space<vmem>>, vector<1x128xf32>
      %127 = vector.shape_cast %126 : vector<1x128xf32> to vector<1x1x128xf32>
      %128 = vector.broadcast %125 : vector<2x16x1xf32> to vector<2x16x128xf32>
      %129 = vector.broadcast %127 : vector<1x1x128xf32> to vector<2x16x128xf32>
      %130 = arith.mulf %128, %129 : vector<2x16x128xf32>
      %131 = arith.addf %124, %130 : vector<2x16x128xf32>
      %c0_52 = arith.constant 0 : index
      %c0_53 = arith.constant 0 : index
      %132 = vector.load %arg6[%c0_52, %c0_53] : memref<1x128xf32, #tpu.memory_space<vmem>>, vector<1x128xf32>
      %133 = vector.shape_cast %132 : vector<1x128xf32> to vector<1x1x128xf32>
      %134 = vector.broadcast %133 : vector<1x1x128xf32> to vector<2x16x128xf32>
      %135 = arith.addf %131, %134 : vector<2x16x128xf32>
      %c0_54 = arith.constant 0 : index
      %c0_55 = arith.constant 0 : index
      %c0_56 = arith.constant 0 : index
      %136 = vector.load %arg17[%c0_54, %c0_55, %c0_56] : memref<2x16x128xf32, #tpu.memory_space<vmem>>, vector<2x16x128xf32>
      tpu.vector_store %arg17[%c0_54, %c0_55, %c0_56], %135 {strides = array<i32>} : memref<2x16x128xf32, #tpu.memory_space<vmem>>, vector<2x16x128xf32>,
    } else {
    }
    %c0 = arith.constant 0 : index
    %c0_1 = arith.constant 0 : index
    %c0_2 = arith.constant 0 : index
    %3 = vector.load %arg17[%c0, %c0_1, %c0_2] : memref<2x16x128xf32, #tpu.memory_space<vmem>>, vector<2x16x128xf32>
    %4 = vector.shape_cast %3 : vector<2x16x128xf32> to vector<32x128xf32>
    %c0_3 = arith.constant 0 : index
    %c0_4 = arith.constant 0 : index
    %c0_5 = arith.constant 0 : index
    %5 = vector.load %arg7[%c0_3, %c0_4, %c0_5] : memref<1x128x384xf32, #tpu.memory_space<vmem>>, vector<1x128x384xf32>
    %6 = vector.shape_cast %5 : vector<1x128x384xf32> to vector<128x384xf32>
    %cst = arith.constant dense<0.000000e+00> : vector<32x384xf32>
    %7 = tpu.matmul %4, %6, %cst {dimension_numbers = #tpu.dot_dimension_numbers<[1], [0], [0], [1], [0, 0, 1, 1], [], []>} : vector<32x128xf32>, vector<128x384xf32>, vector<32x384xf32> -> vector<32x384xf32>
    %8 = vector.shape_cast %7 : vector<32x384xf32> to vector<2x16x384xf32>
    %9 = vector.extract_strided_slice %8 {offsets = [0, 0, 0], sizes = [2, 16, 128], strides = [1, 1, 1]} : vector<2x16x384xf32> to vector<2x16x128xf32>
    %10 = vector.extract_strided_slice %8 {offsets = [0, 0, 128], sizes = [2, 16, 128], strides = [1, 1, 1]} : vector<2x16x384xf32> to vector<2x16x128xf32>
    %11 = vector.extract_strided_slice %8 {offsets = [0, 0, 256], sizes = [2, 16, 128], strides = [1, 1, 1]} : vector<2x16x384xf32> to vector<2x16x128xf32>
    %12 = arith.index_cast %arg1 : i32 to index
    %13 = memref.load %arg2[%12] : memref<2xf32, #tpu.memory_space<smem>>
    %cst_6 = arith.constant 4.000000e+00 : f32
    %14 = arith.mulf %cst_6, %13 : f32
    %c0_7 = arith.constant 0 : index
    %c0_8 = arith.constant 0 : index
    %c0_9 = arith.constant 0 : index
    %15 = vector.load %arg4[%c0_7, %c0_8, %c0_9] : memref<2x16x16xf32, #tpu.memory_space<vmem>>, vector<2x16x16xf32>
    %16 = vector.broadcast %14 : f32 to vector<2x16x16xf32>
    %17 = arith.mulf %16, %15 : vector<2x16x16xf32>
    %cst_10 = arith.constant dense<0xFF800000> : vector<2x16xf32>
    %18 = vector.multi_reduction <maximumf>, %17, %cst_10 [2] : vector<2x16x16xf32> to vector<2x16xf32>
    %19 = vector.shape_cast %18 : vector<2x16xf32> to vector<2x16x1xf32>
    %20 = vector.broadcast %19 : vector<2x16x1xf32> to vector<2x16x16xf32>
    %21 = arith.subf %17, %20 : vector<2x16x16xf32>
    %22 = math.exp %21 : vector<2x16x16xf32>
    %cst_11 = arith.constant dense<0xFF800000> : vector<2x128xf32>
    %23 = vector.multi_reduction <maximumf>, %10, %cst_11 [1] : vector<2x16x128xf32> to vector<2x128xf32>
    %24 = vector.shape_cast %23 : vector<2x128xf32> to vector<2x1x128xf32>
    %25 = vector.broadcast %24 : vector<2x1x128xf32> to vector<2x16x128xf32>
    %26 = arith.subf %10, %25 : vector<2x16x128xf32>
    %27 = math.exp %26 : vector<2x16x128xf32>
    %28 = arith.mulf %27, %11 : vector<2x16x128xf32>
    %29 = tpu.concatenate %28, %27 in 2 : vector<2x16x128xf32>, vector<2x16x128xf32> -> vector<2x16x256xf32>
    "tpu.trace_start"() <{level = 10 : i32, message = "bnm,bmf->bnf"}> : () -> ()
    %cst_12 = arith.constant dense<0.000000e+00> : vector<2x16x256xf32>
    %30 = tpu.matmul %22, %29, %cst_12 {dimension_numbers = #tpu.dot_dimension_numbers<[2], [1], [1], [2], [0, 0, 0, 1, 1, 2], [0], [0]>} : vector<2x16x16xf32>, vector<2x16x256xf32>, vector<2x16x256xf32> -> vector<2x16x256xf32>
    "tpu.trace_stop"() : () -> ()
    %31 = vector.extract_strided_slice %30 {offsets = [0, 0, 0], sizes = [2, 16, 128], strides = [1, 1, 1]} : vector<2x16x256xf32> to vector<2x16x128xf32>
    %32 = vector.extract_strided_slice %30 {offsets = [0, 0, 128], sizes = [2, 16, 128], strides = [1, 1, 1]} : vector<2x16x256xf32> to vector<2x16x128xf32>
    %33 = arith.divf %31, %32 : vector<2x16x128xf32>
    %34 = arith.negf %9 : vector<2x16x128xf32>
    %35 = math.exp %34 : vector<2x16x128xf32>
    %cst_13 = arith.constant 1.000000e+00 : f32
    %36 = vector.broadcast %cst_13 : f32 to vector<2x16x128xf32>
    %37 = arith.addf %36, %35 : vector<2x16x128xf32>
    %38 = arith.divf %36, %37 : vector<2x16x128xf32>
    %39 = arith.mulf %38, %33 : vector<2x16x128xf32>
    %c0_14 = arith.constant 0 : index
    %c0_15 = arith.constant 0 : index
    %c0_16 = arith.constant 0 : index
    %40 = vector.load %arg8[%c0_14, %c0_15, %c0_16] : memref<1x4x128xf32, #tpu.memory_space<vmem>>, vector<1x4x128xf32>
    %41 = vector.shape_cast %40 : vector<1x4x128xf32> to vector<4x128xf32>
    %42 = arith.addf %3, %39 : vector<2x16x128xf32>
    %cst_17 = arith.constant dense<0.000000e+00> : vector<2x128xf32>
    %43 = vector.multi_reduction <add>, %42, %cst_17 [1] : vector<2x16x128xf32> to vector<2x128xf32>
    %44 = vector.shape_cast %43 : vector<2x128xf32> to vector<2x1x128xf32>
    %cst_18 = arith.constant 1.600000e+01 : f32
    %45 = vector.broadcast %cst_18 : f32 to vector<2x1x128xf32>
    %46 = arith.divf %44, %45 : vector<2x1x128xf32>
    %47 = arith.mulf %42, %42 : vector<2x16x128xf32>
    %cst_19 = arith.constant dense<0.000000e+00> : vector<2x128xf32>
    %48 = vector.multi_reduction <add>, %47, %cst_19 [1] : vector<2x16x128xf32> to vector<2x128xf32>
    %49 = vector.shape_cast %48 : vector<2x128xf32> to vector<2x1x128xf32>
    %cst_20 = arith.constant 1.600000e+01 : f32
    %50 = vector.broadcast %cst_20 : f32 to vector<2x1x128xf32>
    %51 = arith.divf %49, %50 : vector<2x1x128xf32>
    %52 = arith.mulf %46, %46 : vector<2x1x128xf32>
    %53 = arith.subf %51, %52 : vector<2x1x128xf32>
    %54 = vector.broadcast %46 : vector<2x1x128xf32> to vector<2x16x128xf32>
    %55 = arith.subf %42, %54 : vector<2x16x128xf32>
    %cst_21 = arith.constant 9.99999974E-6 : f32
    %56 = vector.broadcast %cst_21 : f32 to vector<2x1x128xf32>
    %57 = arith.addf %53, %56 : vector<2x1x128xf32>
    %58 = math.rsqrt %57 : vector<2x1x128xf32>
    %59 = vector.broadcast %58 : vector<2x1x128xf32> to vector<2x16x128xf32>
    %60 = arith.mulf %55, %59 : vector<2x16x128xf32>
    %61 = vector.extract_strided_slice %41 {offsets = [0, 0], sizes = [1, 128], strides = [1, 1]} : vector<4x128xf32> to vector<1x128xf32>
    %62 = vector.shape_cast %61 : vector<1x128xf32> to vector<1x1x128xf32>
    %63 = vector.broadcast %62 : vector<1x1x128xf32> to vector<2x16x128xf32>
    %64 = arith.mulf %60, %63 : vector<2x16x128xf32>
    %65 = vector.extract_strided_slice %41 {offsets = [1, 0], sizes = [1, 128], strides = [1, 1]} : vector<4x128xf32> to vector<1x128xf32>
    %66 = vector.shape_cast %65 : vector<1x128xf32> to vector<1x1x128xf32>
    %67 = vector.broadcast %66 : vector<1x1x128xf32> to vector<2x16x128xf32>
    %68 = arith.addf %64, %67 : vector<2x16x128xf32>
    %69 = vector.shape_cast %68 : vector<2x16x128xf32> to vector<32x128xf32>
    %c0_22 = arith.constant 0 : index
    %c0_23 = arith.constant 0 : index
    %c0_24 = arith.constant 0 : index
    %70 = vector.load %arg9[%c0_22, %c0_23, %c0_24] : memref<1x128x256xf32, #tpu.memory_space<vmem>>, vector<1x128x256xf32>
    %71 = vector.shape_cast %70 : vector<1x128x256xf32> to vector<128x256xf32>
    %cst_25 = arith.constant dense<0.000000e+00> : vector<32x256xf32>
    %72 = tpu.matmul %69, %71, %cst_25 {dimension_numbers = #tpu.dot_dimension_numbers<[1], [0], [0], [1], [0, 0, 1, 1], [], []>} : vector<32x128xf32>, vector<128x256xf32>, vector<32x256xf32> -> vector<32x256xf32>
    %c0_26 = arith.constant 0 : index
    %c0_27 = arith.constant 0 : index
    %c0_28 = arith.constant 0 : index
    %73 = vector.load %arg10[%c0_26, %c0_27, %c0_28] : memref<1x1x256xf32, #tpu.memory_space<vmem>>, vector<1x1x256xf32>
    %74 = vector.shape_cast %73 : vector<1x1x256xf32> to vector<1x256xf32>
    %75 = vector.broadcast %74 : vector<1x256xf32> to vector<32x256xf32>
    %76 = arith.addf %72, %75 : vector<32x256xf32>
    %cst_29 = arith.constant 0.000000e+00 : f32
    %77 = vector.broadcast %cst_29 : f32 to vector<32x256xf32>
    %78 = arith.maximumf %76, %77 : vector<32x256xf32>
    %c0_30 = arith.constant 0 : index
    %c0_31 = arith.constant 0 : index
    %c0_32 = arith.constant 0 : index
    %79 = vector.load %arg11[%c0_30, %c0_31, %c0_32] : memref<1x256x128xf32, #tpu.memory_space<vmem>>, vector<1x256x128xf32>
    %80 = vector.shape_cast %79 : vector<1x256x128xf32> to vector<256x128xf32>
    %cst_33 = arith.constant dense<0.000000e+00> : vector<32x128xf32>
    %81 = tpu.matmul %78, %80, %cst_33 {dimension_numbers = #tpu.dot_dimension_numbers<[1], [0], [0], [1], [0, 0, 1, 1], [], []>} : vector<32x256xf32>, vector<256x128xf32>, vector<32x128xf32> -> vector<32x128xf32>
    %c0_34 = arith.constant 0 : index
    %c0_35 = arith.constant 0 : index
    %c0_36 = arith.constant 0 : index
    %82 = vector.load %arg12[%c0_34, %c0_35, %c0_36] : memref<1x1x128xf32, #tpu.memory_space<vmem>>, vector<1x1x128xf32>
    %83 = vector.shape_cast %82 : vector<1x1x128xf32> to vector<1x128xf32>
    %84 = vector.broadcast %83 : vector<1x128xf32> to vector<32x128xf32>
    %85 = arith.addf %81, %84 : vector<32x128xf32>
    %86 = vector.shape_cast %85 : vector<32x128xf32> to vector<2x16x128xf32>
    %87 = arith.addf %68, %86 : vector<2x16x128xf32>
    %cst_37 = arith.constant dense<0.000000e+00> : vector<2x128xf32>
    %88 = vector.multi_reduction <add>, %87, %cst_37 [1] : vector<2x16x128xf32> to vector<2x128xf32>
    %89 = vector.shape_cast %88 : vector<2x128xf32> to vector<2x1x128xf32>
    %cst_38 = arith.constant 1.600000e+01 : f32
    %90 = vector.broadcast %cst_38 : f32 to vector<2x1x128xf32>
    %91 = arith.divf %89, %90 : vector<2x1x128xf32>
    %92 = arith.mulf %87, %87 : vector<2x16x128xf32>
    %cst_39 = arith.constant dense<0.000000e+00> : vector<2x128xf32>
    %93 = vector.multi_reduction <add>, %92, %cst_39 [1] : vector<2x16x128xf32> to vector<2x128xf32>
    %94 = vector.shape_cast %93 : vector<2x128xf32> to vector<2x1x128xf32>
    %cst_40 = arith.constant 1.600000e+01 : f32
    %95 = vector.broadcast %cst_40 : f32 to vector<2x1x128xf32>
    %96 = arith.divf %94, %95 : vector<2x1x128xf32>
    %97 = arith.mulf %91, %91 : vector<2x1x128xf32>
    %98 = arith.subf %96, %97 : vector<2x1x128xf32>
    %99 = vector.broadcast %91 : vector<2x1x128xf32> to vector<2x16x128xf32>
    %100 = arith.subf %87, %99 : vector<2x16x128xf32>
    %cst_41 = arith.constant 9.99999974E-6 : f32
    %101 = vector.broadcast %cst_41 : f32 to vector<2x1x128xf32>
    %102 = arith.addf %98, %101 : vector<2x1x128xf32>
    %103 = math.rsqrt %102 : vector<2x1x128xf32>
    %104 = vector.broadcast %103 : vector<2x1x128xf32> to vector<2x16x128xf32>
    %105 = arith.mulf %100, %104 : vector<2x16x128xf32>
    %106 = vector.extract_strided_slice %41 {offsets = [2, 0], sizes = [1, 128], strides = [1, 1]} : vector<4x128xf32> to vector<1x128xf32>
    %107 = vector.shape_cast %106 : vector<1x128xf32> to vector<1x1x128xf32>
    %108 = vector.broadcast %107 : vector<1x1x128xf32> to vector<2x16x128xf32>
    %109 = arith.mulf %105, %108 : vector<2x16x128xf32>
    %110 = vector.extract_strided_slice %41 {offsets = [3, 0], sizes = [1, 128], strides = [1, 1]} : vector<4x128xf32> to vector<1x128xf32>
    %111 = vector.shape_cast %110 : vector<1x128xf32> to vector<1x1x128xf32>
    %112 = vector.broadcast %111 : vector<1x1x128xf32> to vector<2x16x128xf32>
    %113 = arith.addf %109, %112 : vector<2x16x128xf32>
    %c0_42 = arith.constant 0 : index
    %c0_43 = arith.constant 0 : index
    %c0_44 = arith.constant 0 : index
    %114 = vector.load %arg17[%c0_42, %c0_43, %c0_44] : memref<2x16x128xf32, #tpu.memory_space<vmem>>, vector<2x16x128xf32>
    tpu.vector_store %arg17[%c0_42, %c0_43, %c0_44], %113 {strides = array<i32>} : memref<2x16x128xf32, #tpu.memory_space<vmem>>, vector<2x16x128xf32>,
    %c1_i32 = arith.constant 1 : i32
    %115 = arith.cmpi eq, %arg1, %c1_i32 : i32
    %116 = arith.extui %115 : i1 to i32
    %c0_i32_45 = arith.constant 0 : i32
    %117 = arith.cmpi ne, %116, %c0_i32_45 : i32
    scf.if %117 {
      %c0_46 = arith.constant 0 : index
      %c0_47 = arith.constant 0 : index
      %c0_48 = arith.constant 0 : index
      %118 = vector.load %arg17[%c0_46, %c0_47, %c0_48] : memref<2x16x128xf32, #tpu.memory_space<vmem>>, vector<2x16x128xf32>
      %119 = vector.shape_cast %118 : vector<2x16x128xf32> to vector<32x128xf32>
      %c0_49 = arith.constant 0 : index
      %c0_50 = arith.constant 0 : index
      %120 = vector.load %arg13[%c0_49, %c0_50] : memref<128x256xf32, #tpu.memory_space<vmem>>, vector<128x256xf32>
      %cst_51 = arith.constant dense<0.000000e+00> : vector<32x256xf32>
      %121 = tpu.matmul %119, %120, %cst_51 {dimension_numbers = #tpu.dot_dimension_numbers<[1], [0], [0], [1], [0, 0, 1, 1], [], []>} : vector<32x128xf32>, vector<128x256xf32>, vector<32x256xf32> -> vector<32x256xf32>
      %122 = vector.shape_cast %121 : vector<32x256xf32> to vector<2x16x256xf32>
      %123 = vector.extract_strided_slice %122 {offsets = [0, 0, 0], sizes = [2, 16, 128], strides = [1, 1, 1]} : vector<2x16x256xf32> to vector<2x16x128xf32>
      %124 = vector.extract_strided_slice %122 {offsets = [0, 0, 128], sizes = [2, 16, 128], strides = [1, 1, 1]} : vector<2x16x256xf32> to vector<2x16x128xf32>
      %cst_52 = arith.constant dense<0xFF800000> : vector<2x128xf32>
      %125 = vector.multi_reduction <maximumf>, %123, %cst_52 [1] : vector<2x16x128xf32> to vector<2x128xf32>
      %126 = vector.shape_cast %125 : vector<2x128xf32> to vector<2x1x128xf32>
      %127 = vector.broadcast %126 : vector<2x1x128xf32> to vector<2x16x128xf32>
      %128 = arith.subf %123, %127 : vector<2x16x128xf32>
      %129 = math.exp %128 : vector<2x16x128xf32>
      %130 = arith.mulf %129, %124 : vector<2x16x128xf32>
      %131 = tpu.concatenate %130, %129 in 2 : vector<2x16x128xf32>, vector<2x16x128xf32> -> vector<2x16x256xf32>
      %c0_53 = arith.constant 0 : index
      %c0_54 = arith.constant 0 : index
      %c0_55 = arith.constant 0 : index
      %132 = vector.load %arg15[%c0_53, %c0_54, %c0_55] : memref<2x16x256xf32, #tpu.memory_space<vmem>>, vector<2x16x256xf32>
      tpu.vector_store %arg15[%c0_53, %c0_54, %c0_55], %131 {strides = array<i32>} : memref<2x16x256xf32, #tpu.memory_space<vmem>>, vector<2x16x256xf32>,
      %133 = vector.extract_strided_slice %118 {offsets = [0, 0, 0], sizes = [1, 16, 128], strides = [1, 1, 1]} : vector<2x16x128xf32> to vector<1x16x128xf32>
      %134 = vector.shape_cast %133 : vector<1x16x128xf32> to vector<16x128xf32>
      %135 = tpu.transpose %134, [1, 0] : vector<16x128xf32> -> vector<128x16xf32>
      %c0_56 = arith.constant 0 : index
      %c0_57 = arith.constant 0 : index
      %c0_58 = arith.constant 0 : index
      %136 = vector.load %arg14[%c0_56, %c0_57, %c0_58] : memref<2x128x16xf32, #tpu.memory_space<vmem>>, vector<1x128x16xf32>
      %137 = vector.shape_cast %136 : vector<1x128x16xf32> to vector<128x16xf32>
      %138 = vector.shape_cast %135 : vector<128x16xf32> to vector<1x128x16xf32>
      tpu.vector_store %arg14[%c0_56, %c0_57, %c0_58], %138 {strides = array<i32>} : memref<2x128x16xf32, #tpu.memory_space<vmem>>, vector<1x128x16xf32>,
      %139 = vector.extract_strided_slice %118 {offsets = [1, 0, 0], sizes = [1, 16, 128], strides = [1, 1, 1]} : vector<2x16x128xf32> to vector<1x16x128xf32>
      %140 = vector.shape_cast %139 : vector<1x16x128xf32> to vector<16x128xf32>
      %141 = tpu.transpose %140, [1, 0] : vector<16x128xf32> -> vector<128x16xf32>
      %c1 = arith.constant 1 : index
      %c0_59 = arith.constant 0 : index
      %c0_60 = arith.constant 0 : index
      %142 = vector.load %arg14[%c1, %c0_59, %c0_60] : memref<2x128x16xf32, #tpu.memory_space<vmem>>, vector<1x128x16xf32>
      %143 = vector.shape_cast %142 : vector<1x128x16xf32> to vector<128x16xf32>
      %144 = vector.shape_cast %141 : vector<128x16xf32> to vector<1x128x16xf32>
      tpu.vector_store %arg14[%c1, %c0_59, %c0_60], %144 {strides = array<i32>} : memref<2x128x16xf32, #tpu.memory_space<vmem>>, vector<1x128x16xf32>,
      %cst_61 = arith.constant dense<0.000000e+00> : vector<2x128xf32>
      %145 = vector.multi_reduction <add>, %118, %cst_61 [1] : vector<2x16x128xf32> to vector<2x128xf32>
      %146 = vector.shape_cast %145 : vector<2x128xf32> to vector<2x1x128xf32>
      %cst_62 = arith.constant 1.600000e+01 : f32
      %147 = vector.broadcast %cst_62 : f32 to vector<2x1x128xf32>
      %148 = arith.divf %146, %147 : vector<2x1x128xf32>
      %c0_63 = arith.constant 0 : index
      %c0_64 = arith.constant 0 : index
      %c0_65 = arith.constant 0 : index
      %149 = vector.load %arg16[%c0_63, %c0_64, %c0_65] : memref<2x1x128xf32, #tpu.memory_space<vmem>>, vector<2x1x128xf32>
      tpu.vector_store %arg16[%c0_63, %c0_64, %c0_65], %148 {strides = array<i32>} : memref<2x1x128xf32, #tpu.memory_space<vmem>>, vector<2x1x128xf32>,
    } else {
    }
    return
  }
  func.func @transform_0(%arg0: i32, %arg1: i32) -> i32 {
    %c0_i32 = arith.constant 0 : i32
    %c0_i32_0 = arith.constant 0 : i32
    return %c0_i32 : i32
  }
  func.func @transform_1(%arg0: i32, %arg1: i32) -> (i32, i32, i32) {
    %c0_i32 = arith.constant 0 : i32
    %c0_i32_0 = arith.constant 0 : i32
    %c0_i32_1 = arith.constant 0 : i32
    return %arg0, %c0_i32, %c0_i32_0 : i32, i32, i32
  }
  func.func @transform_2(%arg0: i32, %arg1: i32) -> (i32, i32, i32) {
    %c0_i32 = arith.constant 0 : i32
    %c0_i32_0 = arith.constant 0 : i32
    %c0_i32_1 = arith.constant 0 : i32
    return %arg0, %c0_i32, %c0_i32_0 : i32, i32, i32
  }
  func.func @transform_3(%arg0: i32, %arg1: i32) -> (i32, i32) {
    %c0_i32 = arith.constant 0 : i32
    %c0_i32_0 = arith.constant 0 : i32
    %c0_i32_1 = arith.constant 0 : i32
    return %c0_i32, %c0_i32_0 : i32, i32
  }
  func.func @transform_4(%arg0: i32, %arg1: i32) -> (i32, i32) {
    %c0_i32 = arith.constant 0 : i32
    %c0_i32_0 = arith.constant 0 : i32
    %c0_i32_1 = arith.constant 0 : i32
    return %c0_i32, %c0_i32_0 : i32, i32
  }
  func.func @transform_5(%arg0: i32, %arg1: i32) -> (i32, i32, i32) {
    %c0_i32 = arith.constant 0 : i32
    %c0_i32_0 = arith.constant 0 : i32
    %c0_i32_1 = arith.constant 0 : i32
    return %arg1, %c0_i32, %c0_i32_0 : i32, i32, i32
  }
  func.func @transform_6(%arg0: i32, %arg1: i32) -> (i32, i32, i32) {
    %c0_i32 = arith.constant 0 : i32
    %c0_i32_0 = arith.constant 0 : i32
    %c0_i32_1 = arith.constant 0 : i32
    return %arg1, %c0_i32, %c0_i32_0 : i32, i32, i32
  }
  func.func @transform_7(%arg0: i32, %arg1: i32) -> (i32, i32, i32) {
    %c0_i32 = arith.constant 0 : i32
    %c0_i32_0 = arith.constant 0 : i32
    %c0_i32_1 = arith.constant 0 : i32
    return %arg1, %c0_i32, %c0_i32_0 : i32, i32, i32
  }
  func.func @transform_8(%arg0: i32, %arg1: i32) -> (i32, i32, i32) {
    %c0_i32 = arith.constant 0 : i32
    %c0_i32_0 = arith.constant 0 : i32
    %c0_i32_1 = arith.constant 0 : i32
    return %arg1, %c0_i32, %c0_i32_0 : i32, i32, i32
  }
  func.func @transform_9(%arg0: i32, %arg1: i32) -> (i32, i32, i32) {
    %c0_i32 = arith.constant 0 : i32
    %c0_i32_0 = arith.constant 0 : i32
    %c0_i32_1 = arith.constant 0 : i32
    return %arg1, %c0_i32, %c0_i32_0 : i32, i32, i32
  }
  func.func @transform_10(%arg0: i32, %arg1: i32) -> (i32, i32, i32) {
    %c0_i32 = arith.constant 0 : i32
    %c0_i32_0 = arith.constant 0 : i32
    %c0_i32_1 = arith.constant 0 : i32
    return %arg1, %c0_i32, %c0_i32_0 : i32, i32, i32
  }
  func.func @transform_11(%arg0: i32, %arg1: i32) -> (i32, i32) {
    %c0_i32 = arith.constant 0 : i32
    %c0_i32_0 = arith.constant 0 : i32
    %c0_i32_1 = arith.constant 0 : i32
    return %c0_i32, %c0_i32_0 : i32, i32
  }
  func.func @transform_12(%arg0: i32, %arg1: i32) -> (i32, i32, i32) {
    %c0_i32 = arith.constant 0 : i32
    %c0_i32_0 = arith.constant 0 : i32
    %c0_i32_1 = arith.constant 0 : i32
    return %arg0, %c0_i32, %c0_i32_0 : i32, i32, i32
  }
  func.func @transform_13(%arg0: i32, %arg1: i32) -> (i32, i32, i32) {
    %c0_i32 = arith.constant 0 : i32
    %c0_i32_0 = arith.constant 0 : i32
    %c0_i32_1 = arith.constant 0 : i32
    return %arg0, %c0_i32, %c0_i32_0 : i32, i32, i32
  }
  func.func @transform_14(%arg0: i32, %arg1: i32) -> (i32, i32, i32) {
    %c0_i32 = arith.constant 0 : i32
    %c0_i32_0 = arith.constant 0 : i32
    %c0_i32_1 = arith.constant 0 : i32
    return %arg0, %c0_i32, %c0_i32_0 : i32, i32, i32
  }
}

</mosaic_0001>

<bundles_post_ra>
// kernel: tpu_custom_call.1
= control target key start
LH: loop header
LB: loop body
LE: loop exit
PB: predicated region body
PF: predicated region fallthrough
CT: control target
= control target key end

     0   :  { %s4105_s0 = inlined_call_operand.vmem [shape: f32[2], index: 0, kind: input, shape index: {}]   ;;  %s4106_s1 = inlined_call_operand.vmem [shape: f32[4,16,2], index: 1, kind: input, shape index: {}]   ;;  %s4107_s2 = inlined_call_operand.vmem [shape: f32[4,16,16], index: 2, kind: input, shape index: {}]   ;;  %s4108_s3 = inlined_call_operand.vmem [shape: f32[2,128], index: 3, kind: input, shape index: {}]   ;;  %s4109_s4 = inlined_call_operand.vmem [shape: f32[1,128], index: 4, kind: input, shape index: {}]   ;;  %s4110_s5 = inlined_call_operand.hbm [shape: f32[2,128,384], index: 5, kind: input, shape index: {}]   ;;  %s4111_s6 = inlined_call_operand.vmem [shape: f32[2,4,128], index: 6, kind: input, shape index: {}]   ;;  %s4112_s7 = inlined_call_operand.hbm [shape: f32[2,128,256], index: 7, kind: input, shape index: {}]   ;;  %s4113_s8 = inlined_call_operand.vmem [shape: f32[2,1,256], index: 8, kind: input, shape index: {}]   ;;  %s4114_s9 = inlined_call_operand.hbm [shape: f32[2,256,128], index: 9, kind: input, shape index: {}]   ;;  %s4115_s10 = inlined_call_operand.vmem [shape: f32[2,1,128], index: 10, kind: input, shape index: {}]   ;;  %s4116_s11 = inlined_call_operand.hbm [shape: f32[128,256], index: 11, kind: input, shape index: {}]   ;;  %s4117_s12 = inlined_call_operand.vmem [shape: f32[4,128,16], index: 12, kind: output, shape index: {0}]   ;;  %s4118_s13 = inlined_call_operand.hbm [shape: f32[4,16,256], index: 13, kind: output, shape index: {1}]   ;;  %s4119_s14 = inlined_call_operand.hbm [shape: f32[4,1,128], index: 14, kind: output, shape index: {2}]  }
   0x1   :  { %4147 = sst [smem:[#allocation37_spill]] %s4105_s0 }
   0x2   :  { %4148 = sst [smem:[#allocation38_spill]] %s4106_s1 }
   0x3   :  { %4149 = sst [smem:[#allocation39_spill]] %s4107_s2 }
   0x4   :  { %4150 = sst [smem:[#allocation40_spill]] %s4108_s3 }
   0x5   :  { %4151 = sst [smem:[#allocation41_spill]] %s4109_s4 }
   0x6   :  { %4152 = sst [smem:[#allocation42_spill]] %s4110_s5 }
   0x7   :  { %4153 = sst [smem:[#allocation43_spill]] %s4111_s6 }
   0x8   :  { %4154 = sst [smem:[#allocation44_spill]] %s4112_s7 }
   0x9   :  { %4155 = sst [smem:[#allocation45_spill]] %s4113_s8 }
   0xa   :  { %4156 = sst [smem:[#allocation46_spill]] %s4114_s9 }
   0xb   :  { %4157 = sst [smem:[#allocation47_spill]] %s4115_s10 }
   0xc   :  { %4158 = sst [smem:[#allocation48_spill]] %s4116_s11 }
   0xd   :  { %4159 = sst [smem:[#allocation49_spill]] %s4117_s12 }
   0xe   :  { %4160 = sst [smem:[#allocation50_spill]] %s4118_s13 }
   0xf   :  { %4161 = sst [smem:[#allocation51_spill]] %s4119_s14 }
  0x10   :  { %20 = vsyncpa [#allocation6], 0 }
  0x11   :  { %21 = vsyncpa [#allocation4], 0 }
  0x12   :  { %23 = vsyncpa [#allocation4 + $0x1], 0 }
  0x13   :  { %24 = vsyncpa [#allocation9], 0 }
  0x14   :  { %26 = vsyncpa [#allocation9 + $0x1], 0 }
  0x15   :  { %27 = vsyncpa [#allocation12], 0 }
  0x16   :  { %28 = vsyncpa [#allocation5], 0 }
  0x17   :  { %30 = vsyncpa [#allocation5 + $0x1], 0 }
  0x18   :  { %31 = vsyncpa [#allocation15], 0 }
  0x19   :  { %33 = vsyncpa [#allocation15 + $0x1], 0  ;;  %s3286_s29 = smov 0   ;;  %s3288_s30 = smov 0  }
  0x1a   :  { %s3290_s15 = smov 0   ;;  %s3292_s16 = smov 0  }
  0x1b   :  { %s3294_s17 = smov 0   ;;  %s3296_s18 = smov 0  }
  0x1c   :  { %s3298_s19 = smov 0   ;;  %s3300_s20 = smov 0  }
  0x1d   :  { %s3302_s21 = smov 0   ;;  %s3304_s22 = smov 0  }
  0x1e   :  { %s3306_s23 = smov 0  }
  0x1f LB: > { %4162 = sst [smem:[#allocation22_spill]] %s3149_s29  ;;  %s48_s24 = sadd.s32 1, %s3181_s21  ;;  %s3189_s23 = sphi %s3306_s23, %s39_s23   ;;  %s3185_s22 = sphi %s3304_s22, %s4229_s22   ;;  %s3181_s21 = sphi %s3302_s21, %s4228_s21   ;;  %s3177_s20 = sphi %s3300_s20, %s4227_s20   ;;  %s3173_s19 = sphi %s3298_s19, %s4226_s19   ;;  %s3169_s18 = sphi %s3296_s18, %s4225_s18   ;;  %s3165_s17 = sphi %s3294_s17, %s4224_s17   ;;  %s3161_s16 = sphi %s3292_s16, %s4223_s16   ;;  %s3157_s15 = sphi %s3290_s15, %s4222_s15   ;;  %s3153_s30 = sphi %s3288_s30, %s4221_s30   ;;  %s3149_s29 = sphi %s3286_s29, %s4220_s29  }
  0x20   : > { %4163 = sst [smem:[#allocation23_spill]] %s3153_s30  ;;  %s51_s25 = sadd.s32 1, %s3185_s22 }
  0x21   : > { %4164 = sst [smem:[#allocation24_spill]] %s3157_s15  ;;  %p49_p0 = scmp.ge.s32.totalorder %s48_s24, 2 }
  0x22   : > { %4165 = sst [smem:[#allocation25_spill]] %s3165_s17  ;;  %s173_s26 = sadd.s32 1, %s3169_s18 }
  0x23   : > { %4166 = sst [smem:[#allocation26_spill]] %s3169_s18  ;;  %p180_p1 = scmp.ne.s32.totalorder %s3169_s18, %s3165_s17 }
  0x24   : > { %4167 = sst [smem:[#allocation27_spill]] %s3181_s21  ;;  %p181_p2 = scmp.eq.s32.totalorder %s3189_s23, 0 }
  0x25   : > { %4168 = sst [smem:[#allocation28_spill]] %s3185_s22  ;;  %s4231_s24 = smov (%p49_p0, %s48_s24), 0 }
  0x26   : > { %4169 = sst [smem:[#allocation29_spill]] %s3189_s23  ;;  %s4233_s25 = smov (!%p49_p0, %s51_s25), %s3185_s22 }
  0x27   : > { %4170 = sst [smem:[#allocation30_spill]] %s4231_s24  ;;  %s170_s27 = ssub.s32 %s3181_s21, %s4231_s24 }
  0x28   : > { %p182_p3 = por %p181_p2, %p180_p1  ;;  %p53_p4 = scmp.ge.s32.totalorder %s4233_s25, 2 }
  0x29   : > { %p171_p5 = scmp.eq.s32.totalorder %s170_s27, 0  ;;  %p2723_p6 = scmp.lt.s32.totalorder %s3189_s23, 4 }
  0x2a   : > { %s4235_s25 = smov (%p53_p4, %s4233_s25), 0  ;;  %s3359_s14 = sand.u32 1, %s3169_s18  }
  0x2b   : > { %4171 = sst [smem:[#allocation31_spill]] %s4235_s25  ;;  %s517_s13 = sand.u32 1, %s3189_s23  }
  0x2c   : > { %s3355_s28 = scalar_select %p171_p5, %s3169_s18, %s173_s26  }
  0x2d   : > { %p3362_p7 = pnand %p2723_p6, %p182_p3  ;;  %s4125_s3 = sshll.u32 %s3359_s14, 8 }
  0x2e   : > { %4172 = sst [smem:[#allocation32_spill]] %s3355_s28  ;;  %s4126_s24 = sshll.u32 %s3181_s21, 12 }
  0x2f   : > { %s4174_s7 = sld [smem:[#allocation44_spill]]  ;;  %s521_s26 = scalar_lea.vmem [#allocation8], %s4125_s3 }
  0x30   : > { %s528_s28 = sshll.u32 %s521_s26, 4  ;;  %s3379_s18 = scalar_lea.sflag [#allocation9], %s517_s13  ;;  %s3377_s28 = int_to_ptr.vmem [resolvable:$true] %s528_s28 }
  0x31   : > { %p3385_p9 = pneg %p3362_p7 }
  0x35   : > { %s3373_s10 = scalar_lea.hbm %s4174_s7, %s4126_s24  ;;  %s2895_s3 = scalar_lea.hbm %s4174_s7, 8192 }
  0x36   : > { %s2890_s8 = scalar_lea.hbm %s3373_s10, 4096  ;;  %p2896_p12 = scmp.lt.u32.totalorder %s3373_s10, %s4174_s7 }
  0x37   : > { %p2891_p8 = scmp.ne.s32.totalorder %s3373_s10, %s2890_s8  ;;  %p2897_p13 = scmp.lt.u32.totalorder %s2895_s3, %s2890_s8 }
  0x38   : > { %p2899_p1 = scmp.lt.u32.totalorder %s2890_s8, %s3373_s10 }
  0x39   : > { %p2893_p10 = pnand %p3385_p9, %p2891_p8  ;;  %p2898_p0 = por %p2897_p13, %p2896_p12 }
  0x3b   : > { %p2894_p11 = pneg %p2893_p10  ;;  %p2900_p2 = por %p2899_p1, %p2898_p0 }
  0x3d   : > { %p2901_p3 = pnand %p2900_p2, %p2894_p11 }
  0x3f   : > { %2904 = shalt.err (!%p2901_p3)
}
  0x40   : > { %s2905_s13 = scalar_lea.vmem %s3377_s28, 4096  ;;  %s3191_s12 = smov [#allocation8]  }
  0x41   : > { %p2906_p4 = scmp.ne.s32.totalorder %s3377_s28, %s2905_s13  ;;  %s2910_s27 = sshll.u32 %s3191_s12, 4  ;;  %s2911_s27 = int_to_ptr.vmem [resolvable:$false] %s2910_s27 }
  0x42   : > { %s2912_s24 = scalar_lea.vmem %s2911_s27, 8192  ;;  %p2913_p8 = scmp.lt.s32.totalorder %s3377_s28, %s2911_s27 }
  0x43   : > { %p2908_p5 = pnand %p2906_p4, %p3385_p9  ;;  %p2914_p10 = scmp.lt.s32.totalorder %s2912_s24, %s2905_s13 }
  0x45   : > { %p2909_p6 = pneg %p2908_p5  ;;  %p2915_p12 = por %p2914_p10, %p2913_p8 }
  0x47   : > { %p2916_p13 = pnand %p2915_p12, %p2909_p6 }
  0x49   : > { %2919 = shalt.err (!%p2916_p13)
}
  0x4a   : > { %s4127_s3 = smov 256   ;;  %s4128_s8 = smov 16  }
  0x4b   : > { %2710 = dma.hbm_to_vmem [thread:$0]  (!%p3362_p7), %s3373_s10, 4096, %s3377_s28, %s3379_s18, %s4127_s3, %s4127_s3, %s4128_s8  }
  0x4c   : > { %s4176_s26 = sshll.u32 %s3181_s21, 12  ;;  %s4177_s9 = sld [smem:[#allocation46_spill]] }
  0x4d   : > { %s4178_s24 = sshll.u32 %s3359_s14, 8  ;;  %s3424_s1 = sadd.s32 4294967295, %s3189_s23  }
  0x4e   : > { %s549_s7 = scalar_lea.vmem [#allocation10], %s4178_s24  ;;  %s2313_s10 = sadd.s32 4294967294, %s3189_s23  }
  0x4f   : > { %s556_s2 = sshll.u32 %s549_s7, 4  ;;  %p186_p11 = scmp.ne.s32.totalorder %s3165_s17, %s3161_s16  ;;  %s3421_s2 = int_to_ptr.vmem [resolvable:$true] %s556_s2 }
  0x50   : > { %p4132_p0 = scmp.eq.s32.totalorder %s3424_s1, 0  ;;  %s373_s28 = ssub.s32 %s3185_s22, %s4235_s25 }
  0x51   : > { %p374_p1 = scmp.eq.s32.totalorder %s373_s28, 0  ;;  %s376_s13 = sadd.s32 1, %s3157_s15 }
  0x52   : > { %s3417_s27 = scalar_lea.hbm %s4177_s9, %s4176_s26  ;;  %p3435_p2 = por %p4132_p0, %p186_p11 }
  0x53   : > { %p386_p3 = scmp.ne.s32.totalorder %s3157_s15, %s3153_s30  ;;  %p387_p4 = scmp.eq.s32.totalorder %s3424_s1, 3 }
  0x54   : > { %s4179_s26 = scalar_select %p3435_p2, 1, 0 }
  0x55   : > { %s3442_s7 = scalar_select %p374_p1, %s3157_s15, %s376_s13  }
  0x56   : > { %p392_p5 = scmp.ne.s32.totalorder %s3153_s30, %s3149_s29  ;;  %p393_p6 = scmp.eq.s32.totalorder %s2313_s10, 3 }
  0x57   : > { %4180 = sst [smem:[#allocation33_spill]] %s3442_s7  ;;  %p2314_p8 = scmp.ge.s32.totalorder %s3189_s23, 1 }
  0x58   : > { %p3448_p10 = por %p387_p4, %p386_p3  ;;  %p426_p12 = scmp.lt.s32.totalorder %s3189_s23, 5 }
  0x59   : > { %p3453_p13 = por %p393_p6, %p392_p5  ;;  %s4186_s0 = sld [smem:[#allocation37_spill]] }
  0x5a   : > { %s4181_s16 = scalar_select %p3448_p10, 1, 0 }
  0x5b   : > { %s4183_s12 = scalar_select %p3453_p13, 1, 0 }
  0x5c   : > { %4182 = sst [smem:[#allocation34_spill]] %s4181_s16  ;;  %p3457_p11 = pnand %p2314_p8, %p426_p12 }
  0x5d   : > { %4184 = sst [smem:[#allocation35_spill]] %s4183_s12  ;;  %s3194_s10 = smov [#allocation11]  }
  0x5e   : > { %s4185_s24 = scalar_select %p3457_p11, 1, 0 }
  0x5f   : > { %s439_s3 = sshll.u32 %s4186_s0, 4  ;;  %p2697_p1 = pneg %p3457_p11  ;;  %s440_s3 = int_to_ptr.vmem [resolvable:$true] %s439_s3 }
  0x60   : > { %s455_s8 = sshll.u32 %s3194_s10, 4  ;;  %s2920_s15 = scalar_lea.vmem %s440_s3, 16  ;;  %s3472_s8 = int_to_ptr.vmem [resolvable:$true] %s455_s8 }
  0x61   : > { %p3468_p3 = pnand %p2697_p1, %p4132_p0  ;;  %p2921_p4 = scmp.ne.s32.totalorder %s440_s3, %s2920_s15 }
  0x62   : > { %p2928_p12 = scmp.lt.s32.totalorder %s440_s3, %s440_s3  ;;  %p2929_p13 = scmp.lt.s32.totalorder %s2920_s15, %s2920_s15 }
  0x63   : > { %p2922_p5 = pneg %p3468_p3 }
  0x64   : > { %p2930_p1 = por %p2929_p13, %p2928_p12 }
  0x65   : > { %p2923_p6 = pnand %p2922_p5, %p2921_p4 }
  0x67   : > { %p2924_p8 = pneg %p2923_p6 }
  0x69   : > { %p2931_p0 = pnand %p2930_p1, %p2924_p8 }
  0x6b   : > { %2934 = shalt.err (!%p2931_p0)
}
  0x6c   : > { %s3195_s28 = smov [#allocation3]   ;;  %s4188_s11 = sld [smem:[#allocation48_spill]] }
  0x6d   : > { %2700 = dma.vmem_to_smem (!%p3468_p3), %s440_s3, 16, %s3195_s28, [#allocation6]  }
  0x72   : > { %s2935_s22 = scalar_lea.hbm %s4188_s11, 4096 }
  0x73   : > { %p2936_p10 = scmp.ne.s32.totalorder %s4188_s11, %s2935_s22  ;;  %p2942_p0 = scmp.lt.u32.totalorder %s2935_s22, %s4188_s11 }
  0x75   : > { %p2938_p4 = pnand %p2936_p10, %p2922_p5 }
  0x77   : > { %p2939_p6 = pneg %p2938_p4 }
  0x79   : > { %p2944_p13 = pnand %p2942_p0, %p2939_p6 }
  0x7b   : > { %2947 = shalt.err (!%p2944_p13)
}
  0x7c   : > { %s2948_s3 = scalar_lea.vmem %s3472_s8, 4096  ;;  %p2956_p2 = scmp.lt.s32.totalorder %s3472_s8, %s3472_s8 }
  0x7d   : > { %p2949_p8 = scmp.ne.s32.totalorder %s3472_s8, %s2948_s3  ;;  %p2957_p10 = scmp.lt.s32.totalorder %s2948_s3, %s2948_s3 }
  0x7f   : > { %p2951_p12 = pnand %p2949_p8, %p2922_p5  ;;  %p2958_p4 = por %p2957_p10, %p2956_p2 }
  0x81   : > { %p2952_p1 = pneg %p2951_p12 }
  0x83   : > { %p2959_p11 = pnand %p2958_p4, %p2952_p1 }
  0x85   : > { %2962 = shalt.err (!%p2959_p11)
}
  0x86   : > { %s4189_s0 = smov 16   ;;  %s4190_s22 = smov 256  }
  0x87   : > { %2703 = dma.hbm_to_vmem [thread:$0]  (!%p3468_p3), %s4188_s11, 4096, %s3472_s8, [#allocation12], %s4190_s22, %s4190_s22, %s4189_s0  }
  0x88   : > { %s4191_s28 = smul.u32 6144, %s3181_s21  ;;  %s4192_s5 = sld [smem:[#allocation42_spill]] }
  0x89   : > { %s4193_s3 = smul.u32 384, %s3359_s14  ;;  %s490_s7 = scalar_lea.sflag [#allocation4], %s3359_s14 }
  0x8b   : > { %s493_s25 = scalar_lea.vmem [#allocation7], %s4193_s3 }
  0x8c   : > { %s500_s29 = sshll.u32 %s493_s25, 4  ;;  %s3520_s29 = int_to_ptr.vmem [resolvable:$true] %s500_s29 }
  0x8e   : > { %s3516_s15 = scalar_lea.hbm %s4192_s5, %s4191_s28  ;;  %s2968_s22 = scalar_lea.hbm %s4192_s5, 12288 }
  0x8f   : > { %s2963_s12 = scalar_lea.hbm %s3516_s15, 6144  ;;  %p2969_p5 = scmp.lt.u32.totalorder %s3516_s15, %s4192_s5 }
  0x90   : > { %p2964_p2 = scmp.ne.s32.totalorder %s3516_s15, %s2963_s12  ;;  %p2970_p6 = scmp.lt.u32.totalorder %s2968_s22, %s2963_s12 }
  0x91   : > { %p2972_p13 = scmp.lt.u32.totalorder %s2963_s12, %s3516_s15 }
  0x92   : > { %p2966_p11 = pnand %p2964_p2, %p3385_p9  ;;  %p2971_p0 = por %p2970_p6, %p2969_p5 }
  0x94   : > { %p2967_p3 = pneg %p2966_p11  ;;  %p2973_p8 = por %p2972_p13, %p2971_p0 }
  0x96   : > { %p2974_p12 = pnand %p2973_p8, %p2967_p3 }
  0x98   : > { %2977 = shalt.err (!%p2974_p12)
}
  0x99   : > { %s2978_s10 = scalar_lea.vmem %s3520_s29, 6144  ;;  %s3196_s3 = smov [#allocation7]  }
  0x9a   : > { %p2979_p1 = scmp.ne.s32.totalorder %s3520_s29, %s2978_s10  ;;  %s2983_s25 = sshll.u32 %s3196_s3, 4  ;;  %s2984_s25 = int_to_ptr.vmem [resolvable:$false] %s2983_s25 }
  0x9b   : > { %s2985_s8 = scalar_lea.vmem %s2984_s25, 12288  ;;  %p2986_p2 = scmp.lt.s32.totalorder %s3520_s29, %s2984_s25 }
  0x9c   : > { %p2981_p10 = pnand %p2979_p1, %p3385_p9  ;;  %p2987_p11 = scmp.lt.s32.totalorder %s2985_s8, %s2978_s10 }
  0x9e   : > { %p2982_p4 = pneg %p2981_p10  ;;  %p2988_p5 = por %p2987_p11, %p2986_p2 }
  0xa0   : > { %p2989_p6 = pnand %p2988_p5, %p2982_p4 }
  0xa2   : > { %2992 = shalt.err (!%p2989_p6)
}
  0xa3   : > { %s3197_s12 = smov 384   ;;  %s3198_s0 = smov 24  }
  0xa4   : > { %2707 = dma.hbm_to_vmem [thread:$0]  (!%p3362_p7), %s3516_s15, 6144, %s3520_s29, %s490_s7, %s3197_s12, %s3197_s12, %s3198_s0  }
  0xa5   : > { %s2993_s22 = scalar_lea.hbm %s3417_s27, 4096  ;;  %s2998_s10 = scalar_lea.hbm %s4177_s9, 8192 }
  0xa6   : > { %p2994_p3 = scmp.ne.s32.totalorder %s3417_s27, %s2993_s22  ;;  %p2999_p8 = scmp.lt.u32.totalorder %s3417_s27, %s4177_s9 }
  0xa7   : > { %p3000_p12 = scmp.lt.u32.totalorder %s2998_s10, %s2993_s22  ;;  %p3002_p10 = scmp.lt.u32.totalorder %s2993_s22, %s3417_s27 }
  0xa8   : > { %p2996_p0 = pnand %p2994_p3, %p3385_p9 }
  0xa9   : > { %p3001_p1 = por %p3000_p12, %p2999_p8 }
  0xaa   : > { %p2997_p13 = pneg %p2996_p0 }
  0xab   : > { %p3003_p4 = por %p3002_p10, %p3001_p1 }
  0xad   : > { %p3004_p2 = pnand %p3003_p4, %p2997_p13 }
  0xaf   : > { %3007 = shalt.err (!%p3004_p2)
}
  0xb0   : > { %s3008_s14 = scalar_lea.vmem %s3421_s2, 4096  ;;  %s3199_s29 = smov [#allocation10]  }
  0xb1   : > { %p3009_p11 = scmp.ne.s32.totalorder %s3421_s2, %s3008_s14  ;;  %s3013_s15 = sshll.u32 %s3199_s29, 4  ;;  %s3014_s15 = int_to_ptr.vmem [resolvable:$false] %s3013_s15 }
  0xb2   : > { %s3015_s7 = scalar_lea.vmem %s3014_s15, 8192  ;;  %p3016_p3 = scmp.lt.s32.totalorder %s3421_s2, %s3014_s15 }
  0xb3   : > { %p3011_p5 = pnand %p3009_p11, %p3385_p9  ;;  %p3017_p0 = scmp.lt.s32.totalorder %s3015_s7, %s3008_s14 }
  0xb5   : > { %p3012_p6 = pneg %p3011_p5  ;;  %p3018_p8 = por %p3017_p0, %p3016_p3 }
  0xb7   : > { %p3019_p12 = pnand %p3018_p8, %p3012_p6 }
  0xb9   : > { %3022 = shalt.err (!%p3019_p12)
}
  0xba   : > { %s3200_s8 = smov 128   ;;  %s3201_s12 = smov 8  }
  0xbb   : > { %2713 = dma.hbm_to_vmem [thread:$0]  (!%p3362_p7), %s3417_s27, 4096, %s3421_s2, %s3379_s18, %s3200_s8, %s3200_s8, %s3201_s12  }
  0xbc   : > { %p4194_p9 = scmp.ne.s32.totalorder %s4185_s24, 0 }
  0xbe   : > { %574 = sbr.rel (%p4194_p9) target bundleno = 1743 (0x6cf), region = 68 }
  0xc5   : > { %p4195_p13 = scmp.eq.s32.totalorder %s3424_s1, 0 }
  0xc7   : > { %3124 = dma.done.wait (%p4195_p13), [#allocation6], 16   ;;  %p4196_p1 = pmov %p4195_p13 }
  0xc8   : > { %s580_s6 = sand.u32 1, %s3165_s17   ;;  %p4197_p10 = scmp.ne.s32.totalorder %s4179_s26, 0 }
  0xc9   : > { %3126 = vsyncadd (%p4196_p1), [#allocation6], 4294967280  ;;  %s2678_s0 = smul.u32 384, %s580_s6  ;;  %s581_s22 = scalar_lea.sflag [#allocation4], %s580_s6 }
  0xcb   : > { %s3575_s28 = scalar_lea.vmem [#allocation7], %s2678_s0 }
  0xcc   : > { %3128 = dma.done.wait (%p4197_p10), %s581_s22, 6144  }
  0xcd   : > { %3130 = vsyncadd (%p4197_p10), %s581_s22, 4294961152  ;;  %s589_s2 = sand.u32 1, %s3424_s1   ;;  %s2327_s4 = sshll.u32 %s580_s6, 8 }
  0xce   : > { %s590_s18 = scalar_lea.sflag [#allocation9], %s589_s2  ;;  %s3582_s27 = scalar_lea.vmem [#allocation8], %s2327_s4 }
  0xcf   : > { %3132 = dma.done.wait (%p4197_p10), %s590_s18, 8192  }
  0xd0   : > { %3134 = vsyncadd (%p4197_p10), %s590_s18, 4294959104  ;;  %s3588_s24 = scalar_lea.vmem [#allocation10], %s2327_s4  ;;  %p4198_p7 = pmov %p4196_p1 }
  0xd1   : > { %p4199_p4 = pmov %p4196_p1 }
  0xd2   : > { %3136 = dma.done.wait (%p4198_p7), [#allocation12], 4096  }
  0xd3   : > { %3138 = vsyncadd (%p4199_p4), [#allocation12], 4294963200 }
  0xd4   : > { %611 = sfence }
  0xd5   : > { %s3595_s13 = sand.u32 1, %s3153_s30   ;;  %s2332_s10 = sshll.u32 %s3177_s20, 1 }
  0xd6   : > { %4200 = sst [smem:[#allocation36_spill]] %s3595_s13  ;;  %s2330_s26 = sshll.u32 %s3595_s13, 6 }
  0xd7   : > { %s2331_s3 = sshll.u32 %s3595_s13, 1  ;;  %p697_p2 = scmp.lt.s32.totalorder %s2332_s10, 3 }
  0xd8   : > { %p710_p11 = scmp.lt.s32.totalorder %s3173_s19, 1  ;;  %s4201_s7 = sld [smem:[#allocation38_spill]] }
  0xd9   : > { %s4237_s10 = smov (!%p697_p2, %s2332_s10), 3  ;;  %s4202_s0 = sld [smem:[#allocation39_spill]] }
  0xda   : > { %s3602_s25 = scalar_select %p710_p11, %s3173_s19, 1 }
  0xdb   : > { %s2384_s1 = sshll.u32 %s4237_s10, 4  ;;  %s2386_s14 = sshll.u32 %s4237_s10, 7 }
  0xdc   : > { %s2338_s2 = sshll.u32 %s3602_s25, 2  ;;  %s2339_s4 = sshll.u32 %s3602_s25, 1 }
  0xdd   : > { %s4203_s9 = sld [smem:[#allocation43_spill]]  ;;  %s4204_s30 = sld [smem:[#allocation45_spill]] }
  0xde   : > { %s701_s8 = scalar_lea.vmem %s4201_s7, %s2384_s1  ;;  %s4205_s15 = sld [smem:[#allocation47_spill]] }
  0xdf   : > { %s3610_s22 = scalar_lea.vmem %s4202_s0, %s2384_s1  ;;  %s4206_s1 = sld [smem:[#allocation49_spill]] }
  0xe0   : > { %s3633_s0 = scalar_lea.vmem [#allocation13], %s2330_s26  ;;  %s3635_s13 = scalar_lea.vmem [#allocation14], %s2331_s3 }
  0xe1   : > { %p2343_p5 = scmp.ne.s32.totalorder %s3173_s19, 0 }
  0xe2   : > { %v736_v0 = vld [vmem:[%s701_s8 + $0x10] sm:$0xff] (!%p2343_p5)  ;;  %v734_v1 = vld [vmem:[%s701_s8] sm:$0xff] (!%p2343_p5)  ;;  %v3202_v2 = vmov (!%p2343_p5), 0   ;;  %v737_v3 = vld [vmem:[%s701_s8 + $0x18] sm:$0xff] (!%p2343_p5)  ;;  %v3203_v5 = vmov (!%p2343_p5), 1   ;;  %s4209_s3 = sld [smem:[#allocation41_spill]] (!%p2343_p5) }
  0xe3   : > { %s3617_s11 = scalar_lea.vmem %s4203_s9, %s2338_s2  ;;  %s3622_s10 = scalar_lea.vmem %s4204_s30, %s2339_s4  ;;  %2831 = vset.pattern.permute.xlu1 (!%p2343_p5), %v3202_v2  ;;  %2830 = vset.pattern.permute.xlu0 (!%p2343_p5), %v3202_v2  ;;  %v735_v4 = vld [vmem:[%s701_s8 + $0x8] sm:$0xff] (!%p2343_p5) }
  0xe4   : > { %s720_s7 = scalar_lea.vmem %s4205_s15, %s3602_s25  ;;  %733 = sbr.rel (%p2343_p5) target bundleno = 376 (0x178), region = 92  ;;  %751 = vperm.xlu1 (!%p2343_p5), %2831, %v736_v0   ;;  %741 = vperm.xlu0 (!%p2343_p5), %2830, %v734_v1  }
  0xe5   : > { %s3631_s6 = scalar_lea.vmem %s4206_s1, %s2386_s14  ;;  %s4207_s30 = sld [smem:[#allocation40_spill]] (!%p2343_p5) }
  0xe8   : > { %756 = vperm.xlu1 (!%p2343_p5), %2831, %v737_v3   ;;  %746 = vperm.xlu0 (!%p2343_p5), %2830, %v735_v4   ;;  %v2346_v18 = vld [vmem:[%s4209_s3] ss:$0 sm:$0xff] (!%p2343_p5) }
  0xeb   : > { %s4208_s26 = smov %s4207_s30  ;;  %v2344_v10 = vld [vmem:[%s4207_s30] ss:$0 sm:$0xff] }
  0xec   : > { %2833 = vset.pattern.permute.xlu1 %v3203_v5  ;;  %2832 = vset.pattern.permute.xlu0 %v3203_v5  ;;  %v2345_v11 = vld [vmem:[%s4208_s26 + $0x1] ss:$0 sm:$0xff] }
  0xed   : > { %773 = vperm.xlu1 %2833, %v735_v4   ;;  %769 = vperm.xlu0 %2832, %v734_v1  }
  0xf1   : > { %777 = vperm.xlu1 %2833, %v736_v0   ;;  %781 = vperm.xlu0 %2832, %v737_v3  }
 0x163   : > { %v752_v6 = vpop.permute.xlu1 %751  ;;  %v742_v7 = vpop.permute.xlu0 %741 }
 0x164   : > { %v763_v14 = vmul.f32 %v2344_v10, %v742_v7  ;;  %v765_v21 = vmul.f32 %v2344_v10, %v752_v6 }
 0x167   : > { %v757_v8 = vpop.permute.xlu1 %756  ;;  %v747_v9 = vpop.permute.xlu0 %746 }
 0x168   : > { %v764_v15 = vmul.f32 %v2344_v10, %v747_v9  ;;  %v766_v22 = vmul.f32 %v2344_v10, %v757_v8 }
 0x16c   : > { %v774_v12 = vpop.permute.xlu1 %773  ;;  %v770_v13 = vpop.permute.xlu0 %769 }
 0x16d   : > { %v789_v16 = vmul.f32 %v2345_v11, %v774_v12  ;;  %v788_v17 = vmul.f32 %v2345_v11, %v770_v13 }
 0x16f   : > { %v793_v19 = vadd.f32 %v789_v16, %v764_v15  ;;  %v792_v20 = vadd.f32 %v788_v17, %v763_v14 }
 0x170   : > { %v778_v23 = vpop.permute.xlu1 %777  ;;  %v782_v24 = vpop.permute.xlu0 %781 }
 0x171   : > { %v804_v25 = vadd.f32 %v2346_v18, %v793_v19  ;;  %v803_v26 = vadd.f32 %v2346_v18, %v792_v20  ;;  %v790_v27 = vmul.f32 %v2345_v11, %v778_v23  ;;  %v791_v28 = vmul.f32 %v2345_v11, %v782_v24 }
 0x173   : > { %808 = vst [vmem:[#allocation2 + $0x8] sm:$0xff] %v804_v25  ;;  %807 = vst [vmem:[#allocation2] sm:$0xff] %v803_v26  ;;  %v794_v29 = vadd.f32 %v790_v27, %v765_v21  ;;  %v795_v30 = vadd.f32 %v791_v28, %v766_v22 }
 0x175   : > { %v805_v31 = vadd.f32 %v2346_v18, %v794_v29  ;;  %v806_v32 = vadd.f32 %v2346_v18, %v795_v30 }
 0x177   : > { %809 = vst [vmem:[#allocation2 + $0x10] sm:$0xff] %v805_v31  ;;  %810 = vst [vmem:[#allocation2 + $0x18] sm:$0xff] %v806_v32 }
 0x178 PF: > { %v816_v33 = vld [vmem:[%s3575_s28 + $0x8] sm:$0xff]  ;;  %v819_v34 = vld [vmem:[%s3575_s28 + $0x20] sm:$0xff]  ;;  %v818_v37 = vld [vmem:[%s3575_s28 + $0x18] sm:$0xff]  ;;  %v3204_v40 = vmov 0.0   ;;  %s3659_s14 = sld [smem:[#allocation3 + %s3173_s19]]  ;;  %vm1048_vm0 = vcmask 130048  }
 0x179   : > { %v815_v35 = vld [vmem:[%s3575_s28] sm:$0xff]  ;;  %v2492_v36 = vpack.c.bf16 %v819_v34, %v816_v33  ;;  %v822_v38 = vld [vmem:[%s3575_s28 + $0x38] sm:$0xff]  ;;  %v825_v39 = vld [vmem:[%s3575_s28 + $0x50] sm:$0xff]  ;;  %927 = vmatprep.mubr.f32.mxu0 %v3204_v40  ;;  %p2356_p6 = scmp.ne.s32.totalorder %s3173_s19, 1 }
 0x17a   : > { %v2494_v41 = vpack.c.bf16 %v818_v37, %v815_v35  ;;  %v2496_v42 = vpack.c.bf16 %v825_v39, %v822_v38  ;;  %v821_v43 = vld [vmem:[%s3575_s28 + $0x30] sm:$0xff]  ;;  %v824_v44 = vld [vmem:[%s3575_s28 + $0x48] sm:$0xff]  ;;  %v831_v46 = vld [vmem:[%s3575_s28 + $0x80] sm:$0xff] }
 0x17b   : > { %v828_v45 = vld [vmem:[%s3575_s28 + $0x68] sm:$0xff]  ;;  %2493 = vmatprep.subr.bf16.mxu0 %v2492_v36  ;;  %v2498_v47 = vpack.c.bf16 %v824_v44, %v821_v43  ;;  %v827_v49 = vld [vmem:[%s3575_s28 + $0x60] sm:$0xff]  ;;  %v830_v50 = vld [vmem:[%s3575_s28 + $0x78] sm:$0xff] }
 0x17c   : > { %2495 = vmatpush1.bf16.msra.mxu0 %v2494_v41  ;;  %v2500_v48 = vpack.c.bf16 %v831_v46, %v828_v45  ;;  %v834_v51 = vld [vmem:[%s3575_s28 + $0x98] sm:$0xff]  ;;  %v837_v52 = vld [vmem:[%s3575_s28 + $0xb0] sm:$0xff]  ;;  %v2502_v53 = vpack.c.bf16 %v830_v50, %v827_v49  ;;  %v836_v56 = vld [vmem:[%s3575_s28 + $0xa8] sm:$0xff] }
 0x17d   : > { %2497 = vmatprep.subr.bf16.mxu0 %v2496_v42  ;;  %v2504_v54 = vpack.c.bf16 %v837_v52, %v834_v51  ;;  %v833_v55 = vld [vmem:[%s3575_s28 + $0x90] sm:$0xff]  ;;  %v840_v57 = vld [vmem:[%s3575_s28 + $0xc8] sm:$0xff]  ;;  %v843_v58 = vld [vmem:[%s3575_s28 + $0xe0] sm:$0xff] }
 0x17e   : > { %v3669_v59 = vld [vmem:[#allocation2] sm:$0xff]  ;;  %v817_v60 = vld [vmem:[%s3575_s28 + $0x10] sm:$0xff]  ;;  %v820_v61 = vld [vmem:[%s3575_s28 + $0x28] sm:$0xff]  ;;  %s1038_s8 = smul.f32 4.0, %s3659_s14  ;;  %v2506_v62 = vpack.c.bf16 %v836_v56, %v833_v55  ;;  %v2508_v3 = vpack.c.bf16 %v843_v58, %v840_v57 }
 0x17f   : > { %2486 = vmatprep.mubr.f32.mxu1 %v3669_v59  ;;  %v839_v63 = vld [vmem:[%s3575_s28 + $0xc0] sm:$0xff]  ;;  %v2524_v0 = vpack.c.bf16 %v820_v61, %v817_v60  ;;  %v826_v2 = vld [vmem:[%s3575_s28 + $0x58] sm:$0xff]  ;;  %v829_v6 = vld [vmem:[%s3575_s28 + $0x70] sm:$0xff] }
 0x180   : > { %2499 = vmatpush1.bf16.msra.mxu0 %v2498_v47  ;;  %v823_v1 = vld [vmem:[%s3575_s28 + $0x40] sm:$0xff]  ;;  %v842_v4 = vld [vmem:[%s3575_s28 + $0xd8] sm:$0xff]  ;;  %v832_v7 = vld [vmem:[%s3575_s28 + $0x88] sm:$0xff]  ;;  %v1043_v11 = vstv %s1038_s8 }
 0x181   : > { %2501 = vmatprep.subr.bf16.mxu0 %v2500_v48  ;;  %v2528_v5 = vpack.c.bf16 %v826_v2, %v823_v1  ;;  %v846_v8 = vld [vmem:[%s3575_s28 + $0xf8] sm:$0xff]  ;;  %v849_v9 = vld [vmem:[%s3575_s28 + $0x110] sm:$0xff]  ;;  %2525 = vmatprep.subr.bf16.mxu1 %v2524_v0  ;;  %v2510_v12 = vpack.c.bf16 %v842_v4, %v839_v63  ;;  %v848_v13 = vld [vmem:[%s3575_s28 + $0x108] sm:$0xff]  ;;  %v2532_v15 = vpack.c.bf16 %v832_v7, %v829_v6 }
 0x182   : > { %v845_v10 = vld [vmem:[%s3575_s28 + $0xf0] sm:$0xff]  ;;  %2527 = vmatpush3.bf16.msra.mxu1 %v2524_v0  ;;  %v852_v14 = vld [vmem:[%s3575_s28 + $0x128] sm:$0xff]  ;;  %v835_v16 = vld [vmem:[%s3575_s28 + $0xa0] sm:$0xff]  ;;  %v2512_v17 = vpack.c.bf16 %v849_v9, %v846_v8 }
 0x183   : > { %2529 = vmatprep.subr.bf16.mxu1 %v2528_v5  ;;  %v838_v18 = vld [vmem:[%s3575_s28 + $0xb8] sm:$0xff]  ;;  %v1039_v19 = vld [vmem:[%s3610_s22] sm:$0xff]  ;;  %v1040_v20 = vld [vmem:[%s3610_s22 + $0x8] sm:$0xff]  ;;  %v2514_v28 = vpack.c.bf16 %v848_v13, %v845_v10 }
 0x184   : > { %2503 = vmatpush1.bf16.msra.mxu0 %v2502_v53  ;;  %v855_v21 = vld [vmem:[%s3575_s28 + $0x140] sm:$0xff]  ;;  %v3691_v22 = vmul.f32 %v1043_v11, %v1039_v19  ;;  %v3693_v23 = vmul.f32 %v1043_v11, %v1040_v20  ;;  %v1041_v24 = vld [vmem:[%s3610_s22 + $0x10] sm:$0xff]  ;;  %v1042_v25 = vld [vmem:[%s3610_s22 + $0x18] sm:$0xff]  ;;  %v2536_v30 = vpack.c.bf16 %v838_v18, %v835_v16 }
 0x185   : > { %2505 = vmatprep.subr.bf16.mxu0 %v2504_v54  ;;  %v3697_v26 = vmul.f32 %v1043_v11, %v1041_v24  ;;  %v3699_v27 = vmul.f32 %v1043_v11, %v1042_v25  ;;  %v851_v29 = vld [vmem:[%s3575_s28 + $0x120] sm:$0xff]  ;;  %v2516_v32 = vpack.c.bf16 %v855_v21, %v852_v14  ;;  %v854_v33 = vld [vmem:[%s3575_s28 + $0x138] sm:$0xff]  ;;  %v841_v34 = vld [vmem:[%s3575_s28 + $0xd0] sm:$0xff] }
 0x186   : > { %2531 = vmatpush3.bf16.msra.mxu1 %v2528_v5  ;;  %v1049_v31 = vsel %vm1048_vm0, %v3691_v22, -inf  ;;  %v844_v35 = vld [vmem:[%s3575_s28 + $0xe8] sm:$0xff]  ;;  %v858_v37 = vld [vmem:[%s3575_s28 + $0x158] sm:$0xff]  ;;  %v861_v38 = vld [vmem:[%s3575_s28 + $0x170] sm:$0xff]  ;;  %v1052_v39 = vsel %vm1048_vm0, %v3693_v23, -inf  ;;  %v2518_v42 = vpack.c.bf16 %v854_v33, %v851_v29 }
 0x187   : > { %2533 = vmatprep.subr.bf16.mxu1 %v2532_v15  ;;  %1050 = vmax.xlane.f32.xlu0 %v1049_v31  ;;  %v1055_v36 = vsel %vm1048_vm0, %v3697_v26, -inf  ;;  %v1058_v41 = vsel %vm1048_vm0, %v3699_v27, -inf  ;;  %v857_v43 = vld [vmem:[%s3575_s28 + $0x150] sm:$0xff]  ;;  %v2540_v44 = vpack.c.bf16 %v844_v35, %v841_v34  ;;  %v2520_v45 = vpack.c.bf16 %v861_v38, %v858_v37  ;;  %v860_v46 = vld [vmem:[%s3575_s28 + $0x168] sm:$0xff]  ;;  %v847_v47 = vld [vmem:[%s3575_s28 + $0x100] sm:$0xff] }
 0x188   : > { %2507 = vmatpush1.bf16.msra.mxu0 %v2506_v62  ;;  %1056 = vmax.xlane.f32.xlu1 %v1055_v36  ;;  %v850_v48 = vld [vmem:[%s3575_s28 + $0x118] sm:$0xff]  ;;  %v2522_v49 = vpack.c.bf16 %v860_v46, %v857_v43  ;;  %v853_v51 = vld [vmem:[%s3575_s28 + $0x130] sm:$0xff]  ;;  %v856_v52 = vld [vmem:[%s3575_s28 + $0x148] sm:$0xff] }
 0x189   : > { %2509 = vmatprep.subr.bf16.mxu0 %v2508_v3  ;;  %v2544_v50 = vpack.c.bf16 %v850_v48, %v847_v47  ;;  %v2548_v53 = vpack.c.bf16 %v856_v52, %v853_v51  ;;  %v859_v54 = vld [vmem:[%s3575_s28 + $0x160] sm:$0xff]  ;;  %v862_v55 = vld [vmem:[%s3575_s28 + $0x178] sm:$0xff]  ;;  %v3725_v56 = vld [vmem:[#allocation2 + $0x8] sm:$0xff] }
 0x18a   : > { %2535 = vmatpush3.bf16.msra.mxu1 %v2532_v15  ;;  %v2552_v57 = vpack.c.bf16 %v862_v55, %v859_v54  ;;  %v3729_v58 = vld [vmem:[#allocation2 + $0x10] sm:$0xff]  ;;  %v3733_v60 = vld [vmem:[#allocation2 + $0x18] sm:$0xff] }
 0x18b   : > { %2537 = vmatprep.subr.bf16.mxu1 %v2536_v30  ;;  %1053 = vmax.xlane.f32.xlu0 %v1052_v39 }
 0x18c   : > { %2511 = vmatpush1.bf16.msra.mxu0 %v2510_v12  ;;  %1059 = vmax.xlane.f32.xlu1 %v1058_v41 }
 0x18d   : > { %2513 = vmatprep.subr.bf16.mxu0 %v2512_v17 }
 0x18e   : > { %2539 = vmatpush3.bf16.msra.mxu1 %v2536_v30 }
 0x18f   : > { %2541 = vmatprep.subr.bf16.mxu1 %v2540_v44 }
 0x190   : > { %2515 = vmatpush1.bf16.msra.mxu0 %v2514_v28 }
 0x191   : > { %2517 = vmatprep.subr.bf16.mxu0 %v2516_v32 }
 0x192   : > { %2543 = vmatpush3.bf16.msra.mxu1 %v2540_v44 }
 0x193   : > { %2545 = vmatprep.subr.bf16.mxu1 %v2544_v50 }
 0x194   : > { %2519 = vmatpush1.bf16.msra.mxu0 %v2518_v42 }
 0x195   : > { %2521 = vmatprep.subr.bf16.mxu0 %v2520_v45 }
 0x196   : > { %2547 = vmatpush3.bf16.msra.mxu1 %v2544_v50 }
 0x197   : > { %2549 = vmatprep.subr.bf16.mxu1 %v2548_v53 }
 0x198   : > { %2523 = vmatpush1.bf16.msra.mxu0 %v2522_v49 }
 0x19a   : > { %2551 = vmatpush3.bf16.msra.mxu1 %v2548_v53 }
 0x19b   : > { %928 = vmatmul.mubr.f32.vlgmr.msra.gmra.mrb[0].mxu0 %v3669_v59  ;;  %2553 = vmatprep.subr.bf16.mxu1 %v2552_v57 }
 0x19c   : > { %933 = vmatprep.mubr.f32.mxu0 %v3204_v40 }
 0x19e   : > { %2555 = vmatpush3.bf16.msra.mxu1 %v2552_v57 }
 0x19f   : > { %934 = vmatmul.mubr.f32.gmra.mrb[2].mxu0 %v3725_v56 }
 0x1a0   : > { %939 = vmatprep.mubr.f32.mxu0 %v3204_v40 }
 0x1a1   : > { %2487 = vmatmul.mubr.f32.vlgmr.msra.gmra.mrb[0].mxu1 %v3725_v56 }
 0x1a2   : > { %2489 = vmatprep.mubr.f32.mxu1 %v3729_v58 }
 0x1a3   : > { %940 = vmatmul.mubr.f32.gmra.mrb[4].mxu0 %v3729_v58 }
 0x1a4   : > { %945 = vmatprep.mubr.f32.mxu0 %v3204_v40 }
 0x1a5   : > { %2490 = vmatmul.mubr.f32.gmra.mrb[2].mxu1 %v3733_v60 }
 0x1a6   : > { %1173 = vmatprep.mubr.f32.mxu1 %v3204_v40 }
 0x1a7   : > { %946 = vmatmul.mubr.f32.gmra.mrb[6].mxu0 %v3733_v60 }
 0x1a8   : > { %1256 = vmatprep.mubr.f32.mxu0 %v3204_v40 }
 0x214   : > { %v1051_v17 = vpop.xlane.xlu0 %1050 }
 0x215   : > { %v1061_v30 = vsub.f32 %v3691_v22, %v1051_v17  ;;  %v1057_v33 = vpop.xlane.xlu1 %1056  ;;  %v1390_v17 = vld [vmem:[%s3582_s27 + $0x58] sm:$0xff] }
 0x216   : > { %v1063_v39 = vsub.f32 %v3697_v26, %v1057_v33 }
 0x217   : > { %v1065_v35 = vmul.f32 1.442695, %v1061_v30  ;;  %v1393_v30 = vld [vmem:[%s3582_s27 + $0x70] sm:$0xff] }
 0x218   : > { %v1054_v31 = vpop.xlane.xlu0 %1053  ;;  %v1069_v45 = vmul.f32 1.442695, %v1063_v39 }
 0x219   : > { %v1062_v36 = vsub.f32 %v3693_v23, %v1054_v31  ;;  %v1060_v44 = vpop.xlane.xlu1 %1059  ;;  %v1396_v31 = vld [vmem:[%s3582_s27 + $0x88] sm:$0xff] }
 0x21a   : > { %v1064_v46 = vsub.f32 %v3699_v27, %v1060_v44  ;;  %v1404_v44 = vld [vmem:[%s3582_s27 + $0xc8] sm:$0xff] }
 0x21b   : > { %v1067_v43 = vmul.f32 1.442695, %v1062_v36  ;;  %v1397_v36 = vld [vmem:[%s3582_s27 + $0x90] sm:$0xff] }
 0x21c   : > { %v1071_v26 = vmul.f32 1.442695, %v1064_v46 }
 0x26e   : > { %v3741_v61 = vpop.f32.mrb[0].mxu0 }
 0x26f   : > { %v931_v62 = vpop.f32.mrb[1].mxu0 }
 0x272   : > { %v3743_v63 = vpop.f32.mrb[2].mxu0 }
 0x273   : > { %v937_v0 = vpop.f32.mrb[3].mxu0 }
 0x274   : > { %v1073_v1 = vmax.f32 %v931_v62, %v937_v0  ;;  %v2488_v6 = vpop.f32.mrb[0].mxu1 }
 0x275   : > { %v1018_v9 = vpop.f32.mrb[1].mxu1 }
 0x276   : > { %v1074_v2 = vrot.slane %v1073_v1, 4  ;;  %v3745_v3 = vpop.f32.mrb[4].mxu0 }
 0x277   : > { %v943_v4 = vpop.f32.mrb[5].mxu0 }
 0x278   : > { %v1075_v5 = vmax.f32 %v1073_v1, %v1074_v2  ;;  %v2491_v13 = vpop.f32.mrb[2].mxu1  ;;  %v1380_v2 = vld [vmem:[%s3582_s27 + $0x8] sm:$0xff] }
 0x279   : > { %v1028_v16 = vpop.f32.mrb[3].mxu1 }
 0x27a   : > { %v1076_v7 = vrot.slane %v1075_v5, 2  ;;  %v3747_v8 = vpop.f32.mrb[6].mxu0 }
 0x27b   : > { %v949_v10 = vpop.f32.mrb[7].mxu0 }
 0x27c   : > { %v1077_v11 = vmax.f32 %v1075_v5, %v1076_v7  ;;  %v1080_v12 = vmax.f32 %v943_v4, %v949_v10  ;;  %v1381_v7 = vld [vmem:[%s3582_s27 + $0x10] sm:$0xff] }
 0x27e   : > { %v1078_v14 = vrot.slane %v1077_v11, 1  ;;  %v1081_v15 = vrot.slane %v1080_v12, 4 }
 0x280   : > { %v1079_v18 = vmax.f32 %v1077_v11, %v1078_v14  ;;  %v1082_v19 = vmax.f32 %v1080_v12, %v1081_v15  ;;  %v1386_v11 = vld [vmem:[%s3582_s27 + $0x38] sm:$0xff]  ;;  %v1385_v14 = vld [vmem:[%s3582_s27 + $0x30] sm:$0xff] }
 0x282   : > { %v1087_v20 = vsub.f32 %v931_v62, %v1079_v18  ;;  %v1088_v21 = vsub.f32 %v937_v0, %v1079_v18  ;;  %v1083_v24 = vrot.slane %v1082_v19, 2 }
 0x284   : > { %v1091_v25 = vmul.f32 1.442695, %v1087_v20  ;;  %v1093_v28 = vmul.f32 1.442695, %v1088_v21  ;;  %v1084_v29 = vmax.f32 %v1082_v19, %v1083_v24  ;;  %v1387_v19 = vld [vmem:[%s3582_s27 + $0x40] sm:$0xff]  ;;  %v1389_v20 = vld [vmem:[%s3582_s27 + $0x50] sm:$0xff] }
 0x285   : > { %v2574_v21 = vpack.c.bf16 %v1389_v20, %v1387_v19  ;;  %v1392_v24 = vld [vmem:[%s3582_s27 + $0x68] sm:$0xff]  ;;  %v1527_v19 = vld [vmem:[%s3588_s24 + $0x38] sm:$0xff]  ;;  %v1544_v20 = vld [vmem:[%s3588_s24 + $0xc0] sm:$0xff] }
 0x286   : > { %2834 = vpow2.f32 %v1091_v25  ;;  %v1085_v32 = vrot.slane %v1084_v29, 1  ;;  %v1394_v25 = vld [vmem:[%s3582_s27 + $0x78] sm:$0xff] }
 0x287   : > { %2836 = vpow2.f32 %v1093_v28  ;;  %v1391_v28 = vld [vmem:[%s3582_s27 + $0x60] sm:$0xff] }
 0x288   : > { %v1086_v34 = vmax.f32 %v1084_v29, %v1085_v32  ;;  %2838 = vpow2.f32 %v1065_v35  ;;  %v2576_v29 = vpack.c.bf16 %v1394_v25, %v1392_v24  ;;  %v1398_v32 = vld [vmem:[%s3582_s27 + $0x98] sm:$0xff]  ;;  %v2578_v33 = vpack.c.bf16 %v1393_v30, %v1391_v28  ;;  %v1395_v35 = vld [vmem:[%s3582_s27 + $0x80] sm:$0xff]  ;;  %v1546_v30 = vld [vmem:[%s3588_s24 + $0xd0] sm:$0xff] }
 0x289   : > { %v2582_v39 = vpack.c.bf16 %v1397_v36, %v1395_v35  ;;  %v1528_v28 = vld [vmem:[%s3588_s24 + $0x40] sm:$0xff]  ;;  %v1531_v35 = vld [vmem:[%s3588_s24 + $0x58] sm:$0xff] }
 0x28a   : > { %v1089_v37 = vsub.f32 %v943_v4, %v1086_v34  ;;  %v1090_v38 = vsub.f32 %v949_v10, %v1086_v34  ;;  %v1382_v4 = vld [vmem:[%s3582_s27 + $0x18] sm:$0xff]  ;;  %v1384_v10 = vld [vmem:[%s3582_s27 + $0x28] sm:$0xff]  ;;  %v2580_v34 = vpack.c.bf16 %v1398_v32, %v1396_v31  ;;  %v1548_v36 = vld [vmem:[%s3588_s24 + $0xe0] sm:$0xff] }
 0x28b   : > { %v2564_v5 = vpack.c.bf16 %v1382_v4, %v1380_v2  ;;  %v2568_v12 = vpack.c.bf16 %v1386_v11, %v1384_v10  ;;  %v1547_v31 = vld [vmem:[%s3588_s24 + $0xd8] sm:$0xff] }
 0x28c   : > { %v1095_v41 = vmul.f32 1.442695, %v1089_v37  ;;  %v1097_v42 = vmul.f32 1.442695, %v1090_v38  ;;  %v1400_v37 = vld [vmem:[%s3582_s27 + $0xa8] sm:$0xff]  ;;  %v1402_v38 = vld [vmem:[%s3582_s27 + $0xb8] sm:$0xff] }
 0x28e   : > { %2840 = vpow2.f32 %v1095_v41  ;;  %v2584_v41 = vpack.c.bf16 %v1402_v38, %v1400_v37  ;;  %v1549_v37 = vld [vmem:[%s3588_s24 + $0xe8] sm:$0xff] }
 0x28f   : > { %2842 = vpow2.f32 %v1097_v42  ;;  %v1399_v42 = vld [vmem:[%s3582_s27 + $0xa0] sm:$0xff] }
 0x290   : > { %v2835_v22 = vpop.eup %2834  ;;  %2844 = vpow2.f32 %v1067_v43  ;;  %v1401_v43 = vld [vmem:[%s3582_s27 + $0xb0] sm:$0xff] }
 0x291   : > { %v2837_v47 = vpop.eup %2836  ;;  %v1099_v48 = vmul.f32 %v2835_v22, %v1018_v9  ;;  %2846 = vpow2.f32 %v1069_v45  ;;  %v2586_v45 = vpack.c.bf16 %v1401_v43, %v1399_v42  ;;  %v2352_v42 = vmul.f32 -1.442695, %v3743_v63 }
 0x292   : > { %v1100_v49 = vmul.f32 %v2837_v47, %v2488_v6  ;;  %v2556_v23 = vpack.c.bf16 %v2837_v47, %v2835_v22  ;;  %v2839_v51 = vpop.eup %2838  ;;  %2848 = vpow2.f32 %v1071_v26  ;;  %v1379_v6 = vld [vmem:[%s3582_s27] sm:$0xff]  ;;  %v1406_v22 = vld [vmem:[%s3582_s27 + $0xd8] sm:$0xff]  ;;  %v2353_v43 = vmul.f32 -1.442695, %v3745_v3 }
 0x293   : > { %v2566_v9 = vpack.c.bf16 %v1381_v7, %v1379_v6  ;;  %v2588_v46 = vpack.c.bf16 %v1406_v22, %v1404_v44  ;;  %v1403_v47 = vld [vmem:[%s3582_s27 + $0xc0] sm:$0xff]  ;;  %v1523_v6 = vld [vmem:[%s3588_s24 + $0x18] sm:$0xff]  ;;  %v2354_v44 = vmul.f32 -1.442695, %v3747_v8 }
 0x294   : > { %v2558_v50 = vpack.c.bf16 %v1100_v49, %v1099_v48  ;;  %2557 = vmatprep.subr.bf16.mxu1 %v2556_v23  ;;  %v1405_v48 = vld [vmem:[%s3582_s27 + $0xd0] sm:$0xff]  ;;  %v1408_v49 = vld [vmem:[%s3582_s27 + $0xe8] sm:$0xff]  ;;  %v1410_v23 = vld [vmem:[%s3582_s27 + $0xf8] sm:$0xff] }
 0x295   : > { %v2592_v26 = vpack.c.bf16 %v1410_v23, %v1408_v49  ;;  %v1540_v7 = vld [vmem:[%s3588_s24 + $0xa0] sm:$0xff] }
 0x296   : > { %2559 = vmatpush1.bf16.msra.mxu1 %v2558_v50  ;;  %v2590_v50 = vpack.c.bf16 %v1405_v48, %v1403_v47 }
 0x297   : > { %2565 = vmatprep.subr.bf16.mxu1 %v2564_v5  ;;  %v1522_v5 = vld [vmem:[%s3588_s24 + $0x10] sm:$0xff] }
 0x298   : > { %v2841_v52 = vpop.eup %2840  ;;  %v2602_v10 = vpack.c.bf16 %v1523_v6, %v1522_v5 }
 0x299   : > { %v2843_v53 = vpop.eup %2842  ;;  %v1101_v54 = vmul.f32 %v2841_v52, %v1028_v16  ;;  %2347 = vmatmul.mubr.msk.f32.vlgmr.msra.gmra.mrb[4].mxu1 %vm1048_vm0, %v2839_v51  ;;  %v1388_v16 = vld [vmem:[%s3582_s27 + $0x48] sm:$0xff]  ;;  %v1407_v51 = vld [vmem:[%s3582_s27 + $0xe0] sm:$0xff] }
 0x29a   : > { %v2845_v55 = vpop.eup %2844  ;;  %v1102_v27 = vmul.f32 %v2843_v53, %v2491_v13  ;;  %1179 = vmatprep.mubr.f32.mxu1 %v3204_v40  ;;  %v2560_v57 = vpack.c.bf16 %v2843_v53, %v2841_v52  ;;  %2567 = vmatpush1.bf16.msra.mxu1 %v2566_v9  ;;  %v1383_v13 = vld [vmem:[%s3582_s27 + $0x20] sm:$0xff]  ;;  %v2572_v18 = vpack.c.bf16 %v1390_v17, %v1388_v16  ;;  %v1409_v52 = vld [vmem:[%s3582_s27 + $0xf0] sm:$0xff]  ;;  %v1541_v9 = vld [vmem:[%s3588_s24 + $0xa8] sm:$0xff] }
 0x29b   : > { %v2847_v0 = vpop.eup %2846  ;;  %v2570_v15 = vpack.c.bf16 %v1385_v14, %v1383_v13  ;;  %2569 = vmatprep.subr.bf16.mxu1 %v2568_v12  ;;  %v2594_v53 = vpack.c.bf16 %v1409_v52, %v1407_v51  ;;  %v2604_v11 = vpack.c.bf16 %v1541_v9, %v1540_v7  ;;  %v1524_v12 = vld [vmem:[%s3588_s24 + $0x20] sm:$0xff]  ;;  %v1525_v13 = vld [vmem:[%s3588_s24 + $0x28] sm:$0xff]  ;;  %v1542_v14 = vld [vmem:[%s3588_s24 + $0xb0] sm:$0xff] }
 0x29c   : > { %v2562_v62 = vpack.c.bf16 %v1102_v27, %v1101_v54  ;;  %2561 = vmatprep.subr.bf16.mxu0 %v2560_v57  ;;  %v2849_v1 = vpop.eup %2848  ;;  %v1536_v54 = vld [vmem:[%s3588_s24 + $0x80] sm:$0xff]  ;;  %v2606_v16 = vpack.c.bf16 %v1525_v13, %v1524_v12 }
 0x29d   : > { %2348 = vmatmul.mubr.msk.f32.gmra.mrb[6].mxu1 %vm1048_vm0, %v2845_v55  ;;  %v1537_v55 = vld [vmem:[%s3588_s24 + $0x88] sm:$0xff]  ;;  %v1520_v27 = vld [vmem:[%s3588_s24] sm:$0xff] }
 0x29e   : > { %2563 = vmatpush1.bf16.msra.mxu0 %v2562_v62  ;;  %1487 = vmatprep.mubr.f32.mxu1 %v3204_v40  ;;  %v2596_v57 = vpack.c.bf16 %v1537_v55, %v1536_v54  ;;  %v1521_v62 = vld [vmem:[%s3588_s24 + $0x8] sm:$0xff] }
 0x29f   : > { %2571 = vmatpush1.bf16.msra.mxu1 %v2570_v15  ;;  %v2598_v2 = vpack.c.bf16 %v1521_v62, %v1520_v27  ;;  %v1543_v15 = vld [vmem:[%s3588_s24 + $0xb8] sm:$0xff] }
 0x2a0   : > { %2573 = vmatprep.subr.bf16.mxu1 %v2572_v18  ;;  %2597 = vmatprep.subr.bf16.mxu0 %v2596_v57  ;;  %v2608_v17 = vpack.c.bf16 %v1543_v15, %v1542_v14  ;;  %v1526_v18 = vld [vmem:[%s3588_s24 + $0x30] sm:$0xff] }
 0x2a1   : > { %2349 = vmatmul.mubr.msk.f32.vlgmr.msra.gmra.mrb[8].mxu0 %vm1048_vm0, %v2847_v0  ;;  %v1538_v0 = vld [vmem:[%s3588_s24 + $0x90] sm:$0xff]  ;;  %v2610_v24 = vpack.c.bf16 %v1527_v19, %v1526_v18 }
 0x2a2   : > { %1262 = vmatprep.mubr.f32.mxu0 %v3204_v40  ;;  %2599 = vmatpush3.bf16.msra.mxu0 %v2598_v2 }
 0x2a3   : > { %2575 = vmatpush1.bf16.msra.mxu1 %v2574_v21  ;;  %v1545_v21 = vld [vmem:[%s3588_s24 + $0xc8] sm:$0xff] }
 0x2a4   : > { %2577 = vmatprep.subr.bf16.mxu1 %v2576_v29  ;;  %v2612_v25 = vpack.c.bf16 %v1545_v21, %v1544_v20  ;;  %v1529_v29 = vld [vmem:[%s3588_s24 + $0x48] sm:$0xff] }
 0x2a5   : > { %2350 = vmatmul.mubr.msk.f32.gmra.mrb[10].mxu0 %vm1048_vm0, %v2849_v1  ;;  %v1539_v1 = vld [vmem:[%s3588_s24 + $0x98] sm:$0xff]  ;;  %v2614_v32 = vpack.c.bf16 %v1529_v29, %v1528_v28 }
 0x2a6   : > { %v2600_v4 = vpack.c.bf16 %v1539_v1, %v1538_v0 }
 0x2a7   : > { %2579 = vmatpush1.bf16.msra.mxu1 %v2578_v33  ;;  %v2616_v33 = vpack.c.bf16 %v1547_v31, %v1546_v30 }
 0x2a8   : > { %2581 = vmatprep.subr.bf16.mxu1 %v2580_v34  ;;  %2601 = vmatprep.subr.bf16.mxu0 %v2600_v4  ;;  %v1530_v34 = vld [vmem:[%s3588_s24 + $0x50] sm:$0xff] }
 0x2a9   : > { %2603 = vmatpush3.bf16.msra.mxu0 %v2602_v10  ;;  %v2618_v38 = vpack.c.bf16 %v1531_v35, %v1530_v34 }
 0x2aa   : > { %2605 = vmatprep.subr.bf16.mxu0 %v2604_v11 }
 0x2ab   : > { %2583 = vmatpush1.bf16.msra.mxu1 %v2582_v39  ;;  %v2620_v39 = vpack.c.bf16 %v1549_v37, %v1548_v36 }
 0x2ac   : > { %2585 = vmatprep.subr.bf16.mxu1 %v2584_v41  ;;  %v2351_v41 = vmul.f32 -1.442695, %v3741_v61 }
 0x2ad   : > { %2607 = vmatpush3.bf16.msra.mxu0 %v2606_v16 }
 0x2ae   : > { %2609 = vmatprep.subr.bf16.mxu0 %v2608_v17  ;;  %2850 = vpow2.f32 %v2351_v41 }
 0x2af   : > { %2587 = vmatpush1.bf16.msra.mxu1 %v2586_v45  ;;  %2852 = vpow2.f32 %v2352_v42 }
 0x2b0   : > { %2589 = vmatprep.subr.bf16.mxu1 %v2588_v46  ;;  %2854 = vpow2.f32 %v2353_v43 }
 0x2b1   : > { %2611 = vmatpush3.bf16.msra.mxu0 %v2610_v24  ;;  %2856 = vpow2.f32 %v2354_v44 }
 0x2b2   : > { %2613 = vmatprep.subr.bf16.mxu0 %v2612_v25 }
 0x2b3   : > { %2591 = vmatpush1.bf16.msra.mxu1 %v2590_v50 }
 0x2b4   : > { %2593 = vmatprep.subr.bf16.mxu1 %v2592_v26 }
 0x2b5   : > { %2615 = vmatpush3.bf16.msra.mxu0 %v2614_v32 }
 0x2b6   : > { %2617 = vmatprep.subr.bf16.mxu0 %v2616_v33 }
 0x2b7   : > { %2595 = vmatpush1.bf16.msra.mxu1 %v2594_v53 }
 0x2b8   : > { %v2851_v22 = vpop.eup %2850 }
 0x2b9   : > { %2619 = vmatpush3.bf16.msra.mxu0 %v2618_v38  ;;  %v1289_v45 = vadd.f32 1.0, %v2851_v22  ;;  %v2853_v47 = vpop.eup %2852 }
 0x2ba   : > { %2621 = vmatprep.subr.bf16.mxu0 %v2620_v39  ;;  %v1290_v49 = vadd.f32 1.0, %v2853_v47  ;;  %v2855_v61 = vpop.eup %2854 }
 0x2bb   : > { %v1291_v63 = vadd.f32 1.0, %v2855_v61  ;;  %v2857_v3 = vpop.eup %2856 }
 0x2bc   : > { %v1292_v52 = vadd.f32 1.0, %v2857_v3 }
 0x36c   : > { %v1175_v46 = vpop.f32.mrb[4].mxu1 }
 0x36d   : > { %v1177_v48 = vpop.f32.mrb[5].mxu1 }
 0x36e   : > { %2858 = vrcp.f32 %v1177_v48 }
 0x36f   : > { %2860 = vrcp.f32 %v1289_v45 }
 0x370   : > { %v1181_v23 = vpop.f32.mrb[6].mxu1 }
 0x371   : > { %v1183_v50 = vpop.f32.mrb[7].mxu1 }
 0x372   : > { %2862 = vrcp.f32 %v1183_v50 }
 0x373   : > { %2864 = vrcp.f32 %v1290_v49 }
 0x374   : > { %v1258_v26 = vpop.f32.mrb[8].mxu0 }
 0x375   : > { %v1260_v51 = vpop.f32.mrb[9].mxu0 }
 0x376   : > { %2866 = vrcp.f32 %v1260_v51 }
 0x377   : > { %2868 = vrcp.f32 %v1291_v63 }
 0x378   : > { %v2859_v8 = vpop.eup %2858  ;;  %v1264_v53 = vpop.f32.mrb[10].mxu0 }
 0x379   : > { %v1270_v54 = vmul.f32 %v2859_v8, %v1175_v46  ;;  %v1266_v55 = vpop.f32.mrb[11].mxu0  ;;  %v2861_v27 = vpop.eup %2860 }
 0x37a   : > { %2870 = vrcp.f32 %v1266_v55 }
 0x37b   : > { %v1301_v57 = vmul.f32 %v2861_v27, %v1270_v54  ;;  %2872 = vrcp.f32 %v1292_v52 }
 0x37c   : > { %v2863_v62 = vpop.eup %2862 }
 0x37d   : > { %v1272_v0 = vmul.f32 %v2863_v62, %v1181_v23  ;;  %v2865_v1 = vpop.eup %2864  ;;  %v3823_v2 = vadd.f32 %v1301_v57, %v3669_v59  ;;  %v1363_v23 = vlaneseq }
 0x37f   : > { %v1302_v4 = vmul.f32 %v2865_v1, %v1272_v0  ;;  %v1327_v10 = vmul.f32 %v3823_v2, %v3823_v2  ;;  %v3843_v51 = vshrl.u32 %v1363_v23, 7  ;;  %v3848_v0 = vld [vmem:[%s3617_s11] sm:$0xf] }
 0x380   : > { %v2867_v5 = vpop.eup %2866 }
 0x381   : > { %v3826_v6 = vadd.f32 %v1302_v4, %v3725_v56  ;;  %v1274_v7 = vmul.f32 %v2867_v5, %v1258_v26  ;;  %v2869_v9 = vpop.eup %2868  ;;  %v1365_v57 = vsub.s32 0, %v3843_v51  ;;  %v1373_v1 = vsub.s32 1, %v3843_v51 }
 0x383   : > { %v1310_v11 = vadd.f32 %v3826_v6, %v3823_v2  ;;  %v1328_v12 = vmul.f32 %v3826_v6, %v3826_v6  ;;  %v1303_v13 = vmul.f32 %v2869_v9, %v1274_v7  ;;  %v1366_v4 = vrot.slane %v3848_v0, %v1365_v57 }
 0x384   : > { %v2871_v14 = vpop.eup %2870  ;;  %v1374_v7 = vrot.slane %v3848_v0, %v1373_v1 }
 0x385   : > { %v1311_v59 = vrot.slane %v1310_v11, 4  ;;  %v1331_v15 = vadd.f32 %v1328_v12, %v1327_v10  ;;  %v1276_v16 = vmul.f32 %v2871_v14, %v1264_v53  ;;  %v2873_v17 = vpop.eup %2872  ;;  %v3835_v56 = vadd.f32 %v1303_v13, %v3729_v58 }
 0x387   : > { %v1312_v18 = vadd.f32 %v1311_v59, %v1310_v11  ;;  %v1332_v19 = vrot.slane %v1331_v15, 4  ;;  %v1304_v20 = vmul.f32 %v2873_v17, %v1276_v16  ;;  %v1329_v28 = vmul.f32 %v3835_v56, %v3835_v56 }
 0x389   : > { %v1313_v21 = vrot.slane %v1312_v18, 2  ;;  %v1333_v24 = vadd.f32 %v1332_v19, %v1331_v15  ;;  %v1309_v25 = vadd.f32 %v1304_v20, %v3733_v60  ;;  %v1532_v19 = vld [vmem:[%s3588_s24 + $0x60] sm:$0xff]  ;;  %v1533_v20 = vld [vmem:[%s3588_s24 + $0x68] sm:$0xff] }
 0x38b   : > { %v1314_v29 = vadd.f32 %v1313_v21, %v1312_v18  ;;  %v1334_v30 = vrot.slane %v1333_v24, 2  ;;  %v1330_v31 = vmul.f32 %v1309_v25, %v1309_v25  ;;  %v1317_v32 = vadd.f32 %v1309_v25, %v3835_v56 }
 0x38c   : > { %v2622_v21 = vpack.c.bf16 %v1533_v20, %v1532_v19 }
 0x38d   : > { %v1335_v33 = vadd.f32 %v1334_v30, %v1333_v24  ;;  %v1315_v34 = vrot.slane %v1314_v29, 1  ;;  %v1318_v35 = vrot.slane %v1317_v32, 4  ;;  %v1338_v58 = vadd.f32 %v1330_v31, %v1329_v28  ;;  %v1550_v24 = vld [vmem:[%s3588_s24 + $0xf0] sm:$0xff]  ;;  %v1535_v30 = vld [vmem:[%s3588_s24 + $0x78] sm:$0xff] }
 0x38e   : > { %2623 = vmatpush3.bf16.msra.mxu0 %v2622_v21 }
 0x38f   : > { %v1336_v36 = vrot.slane %v1335_v33, 1  ;;  %v1316_v37 = vadd.f32 %v1315_v34, %v1314_v29  ;;  %v1319_v38 = vadd.f32 %v1318_v35, %v1317_v32  ;;  %v1339_v39 = vrot.slane %v1338_v58, 4  ;;  %v1534_v29 = vld [vmem:[%s3588_s24 + $0x70] sm:$0xff]  ;;  %v1411_v32 = vld [vmem:[%s3622_s10] sm:$0x3] }
 0x390   : > { %v2626_v31 = vpack.c.bf16 %v1535_v30, %v1534_v29  ;;  %v1420_v34 = vrot.slane %v1411_v32, %v1373_v1 }
 0x391   : > { %v1337_v41 = vadd.f32 %v1336_v36, %v1335_v33  ;;  %v1325_v42 = vmul.f32 0.0625, %v1316_v37  ;;  %v1320_v43 = vrot.slane %v1319_v38, 2  ;;  %v1340_v60 = vadd.f32 %v1339_v39, %v1338_v58 }
 0x392   : > { %v1416_v33 = vrot.slane %v1411_v32, %v1365_v57 }
 0x393   : > { %v1345_v44 = vmul.f32 0.0625, %v1337_v41  ;;  %v1347_v22 = vmul.f32 %v1325_v42, %v1325_v42  ;;  %v1351_v45 = vsub.f32 %v3823_v2, %v1325_v42  ;;  %v1352_v46 = vsub.f32 %v3826_v6, %v1325_v42 }
 0x394   : > { %v1321_v47 = vadd.f32 %v1320_v43, %v1319_v38  ;;  %v1341_v48 = vrot.slane %v1340_v60, 2 }
 0x395   : > { %v1349_v49 = vsub.f32 %v1345_v44, %v1347_v22 }
 0x396   : > { %v1322_v61 = vrot.slane %v1321_v47, 1  ;;  %v1342_v50 = vadd.f32 %v1341_v48, %v1340_v60 }
 0x397   : > { %v1355_v63 = vadd.f32 1e-05, %v1349_v49 }
 0x398   : > { %v1323_v26 = vadd.f32 %v1322_v61, %v1321_v47  ;;  %v1343_v3 = vrot.slane %v1342_v50, 1 }
 0x399   : > { %2874 = vrsqrt.f32 %v1355_v63 }
 0x39a   : > { %v1326_v8 = vmul.f32 0.0625, %v1323_v26  ;;  %v1344_v52 = vadd.f32 %v1343_v3, %v1342_v50 }
 0x39c   : > { %v1346_v53 = vmul.f32 0.0625, %v1344_v52  ;;  %v1348_v54 = vmul.f32 %v1326_v8, %v1326_v8  ;;  %v1353_v55 = vsub.f32 %v3835_v56, %v1326_v8  ;;  %v1354_v27 = vsub.f32 %v1309_v25, %v1326_v8  ;;  %v1551_v25 = vld [vmem:[%s3588_s24 + $0xf8] sm:$0xff]  ;;  %v2355_v52 = vld [vmem:[%s720_s7] ss:$0 sm:$0xff] }
 0x39d   : > { %v2624_v28 = vpack.c.bf16 %v1551_v25, %v1550_v24 }
 0x39e   : > { %v1350_v62 = vsub.f32 %v1346_v53, %v1348_v54 }
 0x39f   : > { %2625 = vmatprep.subr.bf16.mxu0 %v2624_v28 }
 0x3a0   : > { %v1356_v2 = vadd.f32 1e-05, %v1350_v62  ;;  %2627 = vmatpush3.bf16.msra.mxu0 %v2626_v31 }
 0x3a2   : > { %2876 = vrsqrt.f32 %v1356_v2 }
 0x3a3   : > { %v2875_v5 = vpop.eup %2874 }
 0x3a4   : > { %v1359_v6 = vmul.f32 %v2875_v5, %v1351_v45  ;;  %v1360_v9 = vmul.f32 %v2875_v5, %v1352_v46 }
 0x3a6   : > { %v1367_v10 = vmul.f32 %v1366_v4, %v1359_v6  ;;  %v1368_v12 = vmul.f32 %v1366_v4, %v1360_v9 }
 0x3a8   : > { %v3853_v11 = vadd.f32 %v1374_v7, %v1367_v10  ;;  %v3857_v14 = vadd.f32 %v1374_v7, %v1368_v12 }
 0x3aa   : > { %1488 = vmatmul.mubr.f32.vlgmr.msra.gmra.mrb[8].mxu1 %v3853_v11 }
 0x3ab   : > { %1493 = vmatprep.mubr.f32.mxu1 %v3204_v40 }
 0x3ac   : > { %v2877_v13 = vpop.eup %2876 }
 0x3ad   : > { %v1361_v59 = vmul.f32 %v2877_v13, %v1353_v55  ;;  %v1362_v15 = vmul.f32 %v2877_v13, %v1354_v27 }
 0x3ae   : > { %1494 = vmatmul.mubr.f32.gmra.mrb[10].mxu1 %v3857_v14 }
 0x3af   : > { %1499 = vmatprep.mubr.f32.mxu1 %v3204_v40  ;;  %v1369_v16 = vmul.f32 %v1366_v4, %v1361_v59  ;;  %v1370_v56 = vmul.f32 %v1366_v4, %v1362_v15 }
 0x3b1   : > { %v3861_v17 = vadd.f32 %v1374_v7, %v1369_v16  ;;  %v3865_v18 = vadd.f32 %v1374_v7, %v1370_v56 }
 0x3b3   : > { %1500 = vmatmul.mubr.f32.gmra.mrb[12].mxu1 %v3861_v17 }
 0x3b4   : > { %1505 = vmatprep.mubr.f32.mxu1 %v3204_v40 }
 0x3b7   : > { %1506 = vmatmul.mubr.f32.gmra.mrb[14].mxu1 %v3865_v18 }
 0x47d   : > { %v1489_v40 = vpop.f32.mrb[8].mxu1 }
 0x47e   : > { %v1490_v35 = vadd.f32 %v1489_v40, %v1416_v33  ;;  %v1491_v58 = vpop.f32.mrb[9].mxu1 }
 0x47f   : > { %v1492_v36 = vadd.f32 %v1491_v58, %v1420_v34 }
 0x480   : > { %v1512_v39 = vmax.f32 %v1490_v35, 0.0 }
 0x481   : > { %v1513_v37 = vmax.f32 %v1492_v36, 0.0  ;;  %v1495_v38 = vpop.f32.mrb[10].mxu1 }
 0x482   : > { %v1496_v41 = vadd.f32 %v1495_v38, %v1416_v33  ;;  %v1497_v42 = vpop.f32.mrb[11].mxu1 }
 0x483   : > { %v1498_v43 = vadd.f32 %v1497_v42, %v1420_v34  ;;  %1623 = vmatprep.mubr.f32.mxu0 %v1513_v37 }
 0x484   : > { %1624 = vmatmul.mubr.f32.vlgmr.msra.gmra.mrb[12].mxu0 %v1512_v39  ;;  %v1514_v44 = vmax.f32 %v1496_v41, 0.0 }
 0x485   : > { %v1515_v60 = vmax.f32 %v1498_v43, 0.0 }
 0x486   : > { %v1501_v22 = vpop.f32.mrb[12].mxu1 }
 0x487   : > { %v1502_v45 = vadd.f32 %v1501_v22, %v1416_v33  ;;  %v1503_v46 = vpop.f32.mrb[13].mxu1  ;;  %1628 = vmatprep.mubr.f32.mxu0 %v1515_v60 }
 0x488   : > { %v1504_v47 = vadd.f32 %v1503_v46, %v1420_v34  ;;  %1629 = vmatmul.mubr.f32.gmra.mrb[14].mxu0 %v1514_v44 }
 0x489   : > { %v1516_v23 = vmax.f32 %v1502_v45, 0.0 }
 0x48a   : > { %v1517_v48 = vmax.f32 %v1504_v47, 0.0  ;;  %v1507_v49 = vpop.f32.mrb[14].mxu1 }
 0x48b   : > { %v1508_v61 = vadd.f32 %v1507_v49, %v1416_v33  ;;  %v1509_v50 = vpop.f32.mrb[15].mxu1 }
 0x48c   : > { %v1510_v63 = vadd.f32 %v1509_v50, %v1420_v34  ;;  %1633 = vmatprep.mubr.f32.mxu0 %v1517_v48 }
 0x48d   : > { %1634 = vmatmul.mubr.f32.gmra.mrb[16].mxu0 %v1516_v23  ;;  %v1518_v3 = vmax.f32 %v1508_v61, 0.0 }
 0x48e   : > { %v1519_v26 = vmax.f32 %v1510_v63, 0.0 }
 0x490   : > { %1638 = vmatprep.mubr.f32.mxu0 %v1519_v26 }
 0x491   : > { %1639 = vmatmul.mubr.f32.gmra.mrb[18].mxu0 %v1518_v3 }
 0x557   : > { %v2442_v8 = vpop.f32.mrb[12].mxu0 }
 0x558   : > { %v2443_v53 = vpop.f32.mrb[13].mxu0 }
 0x559   : > { %v2444_v54 = vadd.f32 %v2443_v53, %v2442_v8 }
 0x55b   : > { %v1626_v55 = vadd.f32 %v2444_v54, %v2355_v52  ;;  %v2445_v27 = vpop.f32.mrb[14].mxu0  ;;  %v1702_v54 = vsub.s32 2, %v3843_v51 }
 0x55c   : > { %v2446_v57 = vpop.f32.mrb[15].mxu0 }
 0x55d   : > { %v2447_v62 = vadd.f32 %v2446_v57, %v2445_v27  ;;  %v3881_v1 = vadd.f32 %v1626_v55, %v3853_v11  ;;  %v1710_v27 = vsub.s32 3, %v3843_v51 }
 0x55f   : > { %v1631_v2 = vadd.f32 %v2447_v62, %v2355_v52  ;;  %v1664_v9 = vmul.f32 %v3881_v1, %v3881_v1  ;;  %v1703_v62 = vrot.slane %v3848_v0, %v1702_v54  ;;  %v1748_v54 = vld [vmem:[#allocation11 + $0xa0] sm:$0xff] (!%p2356_p6) }
 0x560   : > { %v2448_v4 = vpop.f32.mrb[16].mxu0 }
 0x561   : > { %v3884_v5 = vadd.f32 %v1631_v2, %v3857_v14  ;;  %v2449_v6 = vpop.f32.mrb[17].mxu0 }
 0x562   : > { %v2450_v7 = vadd.f32 %v2449_v6, %v2448_v4 }
 0x563   : > { %v1648_v10 = vadd.f32 %v3884_v5, %v3881_v1  ;;  %v1665_v12 = vmul.f32 %v3884_v5, %v3884_v5 }
 0x564   : > { %v1636_v13 = vadd.f32 %v2450_v7, %v2355_v52  ;;  %v2451_v59 = vpop.f32.mrb[18].mxu0 }
 0x565   : > { %v1649_v11 = vrot.slane %v1648_v10, 4  ;;  %v1668_v15 = vadd.f32 %v1665_v12, %v1664_v9  ;;  %v2452_v16 = vpop.f32.mrb[19].mxu0 }
 0x566   : > { %v2453_v56 = vadd.f32 %v2452_v16, %v2451_v59  ;;  %v1646_v20 = vadd.f32 %v1636_v13, %v3861_v17 }
 0x567   : > { %v1650_v19 = vadd.f32 %v1649_v11, %v1648_v10  ;;  %v1669_v14 = vrot.slane %v1668_v15, 4 }
 0x568   : > { %v1641_v21 = vadd.f32 %v2453_v56, %v2355_v52  ;;  %v1666_v31 = vmul.f32 %v1646_v20, %v1646_v20  ;;  %v1729_v56 = vld [vmem:[#allocation11 + $0x8] sm:$0xff] (!%p2356_p6) }
 0x569   : > { %v1651_v24 = vrot.slane %v1650_v19, 2  ;;  %v1670_v25 = vadd.f32 %v1669_v14, %v1668_v15 }
 0x56a   : > { %v1647_v28 = vadd.f32 %v1641_v21, %v3865_v18  ;;  %v1733_v21 = vld [vmem:[#allocation11 + $0x28] sm:$0xff] (!%p2356_p6) }
 0x56b   : > { %v1652_v29 = vadd.f32 %v1651_v24, %v1650_v19  ;;  %v1671_v30 = vrot.slane %v1670_v25, 2  ;;  %v1728_v19 = vld [vmem:[#allocation11] sm:$0xff] (!%p2356_p6)  ;;  %v1735_v24 = vld [vmem:[#allocation11 + $0x38] sm:$0xff] (!%p2356_p6) }
 0x56c   : > { %v1655_v32 = vadd.f32 %v1647_v28, %v1646_v20  ;;  %v1667_v33 = vmul.f32 %v1647_v28, %v1647_v28 }
 0x56d   : > { %v1653_v34 = vrot.slane %v1652_v29, 1  ;;  %v1672_v40 = vadd.f32 %v1671_v30, %v1670_v25  ;;  %v3205_v25 = vmov (!%p2356_p6), 0.0   ;;  %v1732_v30 = vld [vmem:[#allocation11 + $0x20] sm:$0xff] (!%p2356_p6) }
 0x56e   : > { %v1656_v35 = vrot.slane %v1655_v32, 4  ;;  %v1675_v58 = vadd.f32 %v1667_v33, %v1666_v31  ;;  %1824 = vmatprep.mubr.f32.mxu0 (!%p2356_p6), %v3205_v25  ;;  %1836 = vmatprep.mubr.f32.mxu1 (!%p2356_p6), %v3205_v25  ;;  %v1734_v31 = vld [vmem:[#allocation11 + $0x30] sm:$0xff] (!%p2356_p6)  ;;  %v1739_v33 = vld [vmem:[#allocation11 + $0x58] sm:$0xff] (!%p2356_p6) }
 0x56f   : > { %v1654_v36 = vadd.f32 %v1653_v34, %v1652_v29  ;;  %v1673_v37 = vrot.slane %v1672_v40, 1  ;;  %v2632_v29 = vpack.c.bf16 (!%p2356_p6), %v1735_v24, %v1733_v21  ;;  %v2634_v34 = vpack.c.bf16 (!%p2356_p6), %v1734_v31, %v1732_v30 }
 0x570   : > { %v1657_v38 = vadd.f32 %v1656_v35, %v1655_v32  ;;  %v1676_v39 = vrot.slane %v1675_v58, 4  ;;  %v1737_v32 = vld [vmem:[#allocation11 + $0x48] sm:$0xff] (!%p2356_p6)  ;;  %v1736_v35 = vld [vmem:[#allocation11 + $0x40] sm:$0xff] (!%p2356_p6) }
 0x571   : > { %v1662_v41 = vmul.f32 0.0625, %v1654_v36  ;;  %v1674_v17 = vadd.f32 %v1673_v37, %v1672_v40  ;;  %v2636_v40 = vpack.c.bf16 (!%p2356_p6), %v1739_v33, %v1737_v32  ;;  %v1741_v36 = vld [vmem:[#allocation11 + $0x68] sm:$0xff] (!%p2356_p6)  ;;  %v1743_v37 = vld [vmem:[#allocation11 + $0x78] sm:$0xff] (!%p2356_p6) }
 0x572   : > { %v1658_v42 = vrot.slane %v1657_v38, 2  ;;  %v1677_v43 = vadd.f32 %v1676_v39, %v1675_v58  ;;  %v1738_v58 = vld [vmem:[#allocation11 + $0x50] sm:$0xff] (!%p2356_p6)  ;;  %v2640_v39 = vpack.c.bf16 (!%p2356_p6), %v1743_v37, %v1741_v36 }
 0x573   : > { %v1682_v60 = vmul.f32 0.0625, %v1674_v17  ;;  %v1684_v44 = vmul.f32 %v1662_v41, %v1662_v41  ;;  %v1688_v18 = vsub.f32 %v3881_v1, %v1662_v41  ;;  %v1689_v22 = vsub.f32 %v3884_v5, %v1662_v41  ;;  %v1740_v41 = vld [vmem:[#allocation11 + $0x60] sm:$0xff] (!%p2356_p6)  ;;  %v1742_v17 = vld [vmem:[#allocation11 + $0x70] sm:$0xff] (!%p2356_p6) }
 0x574   : > { %v1659_v45 = vadd.f32 %v1658_v42, %v1657_v38  ;;  %v1678_v46 = vrot.slane %v1677_v43, 2  ;;  %v1711_v5 = vrot.slane %v3848_v0, %v1710_v27  ;;  %v1731_v0 = vld [vmem:[#allocation11 + $0x18] sm:$0xff] (!%p2356_p6)  ;;  %v2638_v38 = vpack.c.bf16 (!%p2356_p6), %v1738_v58, %v1736_v35  ;;  %v1745_v42 = vld [vmem:[#allocation11 + $0x88] sm:$0xff] (!%p2356_p6) }
 0x575   : > { %v1686_v47 = vsub.f32 %v1682_v60, %v1684_v44  ;;  %v2628_v14 = vpack.c.bf16 (!%p2356_p6), %v1731_v0, %v1729_v56  ;;  %v1753_v27 = vld [vmem:[#allocation11 + $0xc8] sm:$0xff] (!%p2356_p6)  ;;  %v1756_v56 = vld [vmem:[#allocation11 + $0xe0] sm:$0xff] (!%p2356_p6)  ;;  %v1758_v0 = vld [vmem:[#allocation11 + $0xf0] sm:$0xff] (!%p2356_p6) }
 0x576   : > { %v1660_v48 = vrot.slane %v1659_v45, 1  ;;  %v1679_v49 = vadd.f32 %v1678_v46, %v1677_v43  ;;  %v1747_v43 = vld [vmem:[#allocation11 + $0x98] sm:$0xff] (!%p2356_p6) }
 0x577   : > { %v1692_v23 = vadd.f32 1e-05, %v1686_v47  ;;  %2629 = vmatprep.subr.bf16.mxu0 (!%p2356_p6), %v2628_v14  ;;  %2660 = vmatprep.subr.bf16.mxu1 (!%p2356_p6), %v2628_v14 }
 0x578   : > { %v1661_v61 = vadd.f32 %v1660_v48, %v1659_v45  ;;  %v1680_v50 = vrot.slane %v1679_v49, 1  ;;  %v2642_v45 = vpack.c.bf16 (!%p2356_p6), %v1742_v17, %v1740_v41  ;;  %v2644_v48 = vpack.c.bf16 (!%p2356_p6), %v1747_v43, %v1745_v42 }
 0x579   : > { %2878 = vrsqrt.f32 %v1692_v23  ;;  %v1746_v23 = vld [vmem:[#allocation11 + $0x90] sm:$0xff] (!%p2356_p6) }
 0x57a   : > { %v1663_v63 = vmul.f32 0.0625, %v1661_v61  ;;  %v1681_v26 = vadd.f32 %v1680_v50, %v1679_v49  ;;  %v1744_v49 = vld [vmem:[#allocation11 + $0x80] sm:$0xff] (!%p2356_p6)  ;;  %v1749_v61 = vld [vmem:[#allocation11 + $0xa8] sm:$0xff] (!%p2356_p6)  ;;  %v1751_v50 = vld [vmem:[#allocation11 + $0xb8] sm:$0xff] (!%p2356_p6) }
 0x57c   : > { %v1683_v3 = vmul.f32 0.0625, %v1681_v26  ;;  %v1685_v8 = vmul.f32 %v1663_v63, %v1663_v63  ;;  %v1690_v52 = vsub.f32 %v1646_v20, %v1663_v63  ;;  %v1691_v53 = vsub.f32 %v1647_v28, %v1663_v63  ;;  %v1730_v20 = vld [vmem:[#allocation11 + $0x10] sm:$0xff] (!%p2356_p6) }
 0x57d   : > { %v2630_v28 = vpack.c.bf16 (!%p2356_p6), %v1730_v20, %v1728_v19  ;;  %v2658_v20 = vpack.c.bf16 (!%p2356_p6), %v1758_v0, %v1756_v56 }
 0x57e   : > { %v1687_v55 = vsub.f32 %v1683_v3, %v1685_v8  ;;  %v2646_v3 = vpack.c.bf16 (!%p2356_p6), %v1746_v23, %v1744_v49 }
 0x57f   : > { %2631 = vmatpush1.bf16.msra.mxu0 (!%p2356_p6), %v2630_v28  ;;  %2668 = vmatpush1.bf16.msra.mxu1 (!%p2356_p6), %v2630_v28 }
 0x580   : > { %v1693_v57 = vadd.f32 1e-05, %v1687_v55  ;;  %2633 = vmatprep.subr.bf16.mxu0 (!%p2356_p6), %v2632_v29  ;;  %2661 = vmatprep.subr.bf16.mxu1 (!%p2356_p6), %v2632_v29  ;;  %v1750_v55 = vld [vmem:[#allocation11 + $0xb0] sm:$0xff] (!%p2356_p6) }
 0x582   : > { %2880 = vrsqrt.f32 %v1693_v57  ;;  %v1755_v57 = vld [vmem:[#allocation11 + $0xd8] sm:$0xff] (!%p2356_p6) }
 0x583   : > { %v2879_v1 = vpop.eup %2878  ;;  %2635 = vmatpush1.bf16.msra.mxu0 (!%p2356_p6), %v2634_v34  ;;  %2669 = vmatpush1.bf16.msra.mxu1 (!%p2356_p6), %v2634_v34 }
 0x584   : > { %v1696_v2 = vmul.f32 %v2879_v1, %v1688_v18  ;;  %v1697_v4 = vmul.f32 %v2879_v1, %v1689_v22  ;;  %2637 = vmatprep.subr.bf16.mxu0 (!%p2356_p6), %v2636_v40  ;;  %2662 = vmatprep.subr.bf16.mxu1 (!%p2356_p6), %v2636_v40 }
 0x586   : > { %v1704_v6 = vmul.f32 %v1703_v62, %v1696_v2  ;;  %v1705_v7 = vmul.f32 %v1703_v62, %v1697_v4  ;;  %v2650_v2 = vpack.c.bf16 (!%p2356_p6), %v1750_v55, %v1748_v54 }
 0x587   : > { %2639 = vmatpush1.bf16.msra.mxu0 (!%p2356_p6), %v2638_v38  ;;  %2670 = vmatpush1.bf16.msra.mxu1 (!%p2356_p6), %v2638_v38 }
 0x588   : > { %v1712_v9 = vadd.f32 %v1711_v5, %v1704_v6  ;;  %v1713_v10 = vadd.f32 %v1711_v5, %v1705_v7  ;;  %2641 = vmatprep.subr.bf16.mxu0 (!%p2356_p6), %v2640_v39  ;;  %2663 = vmatprep.subr.bf16.mxu1 (!%p2356_p6), %v2640_v39  ;;  %v2652_v6 = vpack.c.bf16 (!%p2356_p6), %v1755_v57, %v1753_v27  ;;  %v1752_v7 = vld [vmem:[#allocation11 + $0xc0] sm:$0xff] (!%p2356_p6) }
 0x58a   : > { %1716 = vst [vmem:[#allocation2] sm:$0xff] %v1712_v9  ;;  %1717 = vst [vmem:[#allocation2 + $0x8] sm:$0xff] %v1713_v10  ;;  %v1754_v9 = vld [vmem:[#allocation11 + $0xd0] sm:$0xff] (!%p2356_p6)  ;;  %v1757_v10 = vld [vmem:[#allocation11 + $0xe8] sm:$0xff] (!%p2356_p6) }
 0x58b   : > { %2643 = vmatpush1.bf16.msra.mxu0 (!%p2356_p6), %v2642_v45  ;;  %2671 = vmatpush1.bf16.msra.mxu1 (!%p2356_p6), %v2642_v45 }
 0x58c   : > { %v2881_v12 = vpop.eup %2880  ;;  %2645 = vmatprep.subr.bf16.mxu0 (!%p2356_p6), %v2644_v48  ;;  %2664 = vmatprep.subr.bf16.mxu1 (!%p2356_p6), %v2644_v48 }
 0x58d   : > { %v1698_v13 = vmul.f32 %v2881_v12, %v1690_v52  ;;  %v1699_v59 = vmul.f32 %v2881_v12, %v1691_v53  ;;  %1723 = sbr.rel (%p2356_p6) target bundleno = 1689 (0x699), region = 96  ;;  %v2648_v53 = vpack.c.bf16 (!%p2356_p6), %v1751_v50, %v1749_v61  ;;  %v1759_v12 = vld [vmem:[#allocation11 + $0xf8] sm:$0xff] (!%p2356_p6) }
 0x58f   : > { %v1706_v11 = vmul.f32 %v1703_v62, %v1698_v13  ;;  %v1707_v51 = vmul.f32 %v1703_v62, %v1699_v59  ;;  %2647 = vmatpush1.bf16.msra.mxu0 (!%p2356_p6), %v2646_v3  ;;  %2672 = vmatpush1.bf16.msra.mxu1 (!%p2356_p6), %v2646_v3 }
 0x590   : > { %2649 = vmatprep.subr.bf16.mxu0 (!%p2356_p6), %v2648_v53  ;;  %2665 = vmatprep.subr.bf16.mxu1 (!%p2356_p6), %v2648_v53 }
 0x591   : > { %v1714_v15 = vadd.f32 %v1711_v5, %v1706_v11  ;;  %v1715_v16 = vadd.f32 %v1711_v5, %v1707_v51  ;;  %v3903_v60 = vld [vmem:[#allocation2] sm:$0xff] (!%p2356_p6)  ;;  %v3907_v18 = vld [vmem:[#allocation2 + $0x8] sm:$0xff] (!%p2356_p6)  ;;  %v2654_v11 = vpack.c.bf16 (!%p2356_p6), %v1754_v9, %v1752_v7 }
 0x592   : > { %1887 = vxpose.xlu0.b32.start [1/2] (short) (!%p2356_p6), %v3903_v60, 128  ;;  %v1984_v46 = vadd.f32 (!%p2356_p6), %v3907_v18, %v3903_v60 }
 0x593   : > { %1718 = vst [vmem:[#allocation2 + $0x10] sm:$0xff] %v1714_v15  ;;  %1719 = vst [vmem:[#allocation2 + $0x18] sm:$0xff] %v1715_v16  ;;  %2651 = vmatpush1.bf16.msra.mxu0 (!%p2356_p6), %v2650_v2  ;;  %2673 = vmatpush1.bf16.msra.mxu1 (!%p2356_p6), %v2650_v2  ;;  %v2656_v16 = vpack.c.bf16 (!%p2356_p6), %v1759_v12, %v1757_v10 }
 0x594   : > { %v1985_v63 = vrot.slane %v1984_v46, 4  ;;  %2653 = vmatprep.subr.bf16.mxu0 %v2652_v6  ;;  %2666 = vmatprep.subr.bf16.mxu1 %v2652_v6 }
 0x596   : > { %1888 = vxpose.xlu0.b32.end [2/2] (short) %v3907_v18, 128  ;;  %v1986_v8 = vadd.f32 %v1985_v63, %v1984_v46 }
 0x597   : > { %2655 = vmatpush1.bf16.msra.mxu0 %v2654_v11  ;;  %2674 = vmatpush1.bf16.msra.mxu1 %v2654_v11 }
 0x598   : > { %v1987_v62 = vrot.slane %v1986_v8, 2  ;;  %2657 = vmatprep.subr.bf16.mxu0 %v2656_v16  ;;  %2667 = vmatprep.subr.bf16.mxu1 %v2656_v16 }
 0x59a   : > { %v3905_v44 = vld [vmem:[#allocation2 + $0x10] sm:$0xff]  ;;  %v3909_v22 = vld [vmem:[#allocation2 + $0x18] sm:$0xff]  ;;  %v1988_v4 = vadd.f32 %v1987_v62, %v1986_v8 }
 0x59b   : > { %v1991_v47 = vadd.f32 %v3909_v22, %v3905_v44  ;;  %1935 = vxpose.xlu1.b32.start [1/2] (short) %v3905_v44, 128  ;;  %2659 = vmatpush1.bf16.msra.mxu0 %v2658_v20 }
 0x59c   : > { %v1989_v13 = vrot.slane %v1988_v4, 1  ;;  %2675 = vmatpush1.bf16.msra.mxu1 %v2658_v20 }
 0x59d   : > { %v1992_v26 = vrot.slane %v1991_v47, 4 }
 0x59e   : > { %v1990_v51 = vadd.f32 %v1989_v13, %v1988_v4  ;;  %1825 = vmatmul.mubr.f32.vlgmr.msra.gmra.mrb[0].mxu0 %v3903_v60 }
 0x59f   : > { %v1993_v52 = vadd.f32 %v1992_v26, %v1991_v47  ;;  %1936 = vxpose.xlu1.b32.end [2/2] (short) %v3909_v22, 128  ;;  %1837 = vmatmul.mubr.f32.vlgmr.msra.gmra.mrb[0].mxu1 %v3905_v44 }
 0x5a0   : > { %v1998_v19 = vmul.f32 0.0625, %v1990_v51  ;;  %1830 = vmatprep.mubr.f32.mxu0 %v3205_v25  ;;  %1842 = vmatprep.mubr.f32.mxu1 %v3205_v25 }
 0x5a1   : > { %v1994_v1 = vrot.slane %v1993_v52, 2 }
 0x5a2   : > { %2000 = vst [vmem:[%s3635_s13] sm:$0x1] %v1998_v19  ;;  %1831 = vmatmul.mubr.f32.gmra.mrb[2].mxu0 %v3907_v18 }
 0x5a3   : > { %v1995_v5 = vadd.f32 %v1994_v1, %v1993_v52  ;;  %1843 = vmatmul.mubr.f32.gmra.mrb[2].mxu1 %v3909_v22 }
 0x5a5   : > { %v1996_v59 = vrot.slane %v1995_v5, 1 }
 0x5a7   : > { %v1997_v15 = vadd.f32 %v1996_v59, %v1995_v5 }
 0x5a9   : > { %v1999_v14 = vmul.f32 0.0625, %v1997_v15 }
 0x5ab   : > { %2001 = vst [vmem:[%s3635_s13 + $0x1] sm:$0x1] %v1999_v14 }
 0x612   : > { %v1903_v21 = vpop.trf.xlu0 }
 0x613   : > { %1919 = vst.msk [vmem:[%s3631_s6] sm:$0xff] %vm1048_vm0, %v1903_v21 }
 0x616   : > { %v1904_v28 = vpop.trf.xlu0 }
 0x617   : > { %1920 = vst.msk [vmem:[%s3631_s6 + $0x8] sm:$0xff] %vm1048_vm0, %v1904_v28 }
 0x61a   : > { %v1905_v25 = vpop.trf.xlu0 }
 0x61b   : > { %v1951_v24 = vpop.trf.xlu1  ;;  %1921 = vst.msk [vmem:[%s3631_s6 + $0x10] sm:$0xff] %vm1048_vm0, %v1905_v25 }
 0x61c   : > { %2357 = vst.msk [vmem:[%s3631_s6 + $0x80] sm:$0xff] %vm1048_vm0, %v1951_v24 }
 0x61e   : > { %v1906_v31 = vpop.trf.xlu0 }
 0x61f   : > { %v1952_v29 = vpop.trf.xlu1  ;;  %1922 = vst.msk [vmem:[%s3631_s6 + $0x18] sm:$0xff] %vm1048_vm0, %v1906_v31 }
 0x620   : > { %2358 = vst.msk [vmem:[%s3631_s6 + $0x88] sm:$0xff] %vm1048_vm0, %v1952_v29 }
 0x622   : > { %v1907_v33 = vpop.trf.xlu0 }
 0x623   : > { %v1953_v30 = vpop.trf.xlu1  ;;  %1923 = vst.msk [vmem:[%s3631_s6 + $0x20] sm:$0xff] %vm1048_vm0, %v1907_v33 }
 0x624   : > { %2359 = vst.msk [vmem:[%s3631_s6 + $0x90] sm:$0xff] %vm1048_vm0, %v1953_v30 }
 0x626   : > { %v1908_v40 = vpop.trf.xlu0 }
 0x627   : > { %v1954_v32 = vpop.trf.xlu1  ;;  %1924 = vst.msk [vmem:[%s3631_s6 + $0x28] sm:$0xff] %vm1048_vm0, %v1908_v40 }
 0x628   : > { %2360 = vst.msk [vmem:[%s3631_s6 + $0x98] sm:$0xff] %vm1048_vm0, %v1954_v32 }
 0x62a   : > { %v1909_v58 = vpop.trf.xlu0 }
 0x62b   : > { %v1955_v34 = vpop.trf.xlu1  ;;  %1925 = vst.msk [vmem:[%s3631_s6 + $0x30] sm:$0xff] %vm1048_vm0, %v1909_v58 }
 0x62c   : > { %2361 = vst.msk [vmem:[%s3631_s6 + $0xa0] sm:$0xff] %vm1048_vm0, %v1955_v34 }
 0x62e   : > { %v1910_v37 = vpop.trf.xlu0 }
 0x62f   : > { %v1956_v35 = vpop.trf.xlu1  ;;  %1926 = vst.msk [vmem:[%s3631_s6 + $0x38] sm:$0xff] %vm1048_vm0, %v1910_v37 }
 0x630   : > { %2362 = vst.msk [vmem:[%s3631_s6 + $0xa8] sm:$0xff] %vm1048_vm0, %v1956_v35 }
 0x632   : > { %v1911_v39 = vpop.trf.xlu0 }
 0x633   : > { %v1957_v36 = vpop.trf.xlu1  ;;  %1927 = vst.msk [vmem:[%s3631_s6 + $0x40] sm:$0xff] %vm1048_vm0, %v1911_v39 }
 0x634   : > { %2363 = vst.msk [vmem:[%s3631_s6 + $0xb0] sm:$0xff] %vm1048_vm0, %v1957_v36 }
 0x636   : > { %v1912_v17 = vpop.trf.xlu0 }
 0x637   : > { %v1958_v38 = vpop.trf.xlu1  ;;  %1928 = vst.msk [vmem:[%s3631_s6 + $0x48] sm:$0xff] %vm1048_vm0, %v1912_v17 }
 0x638   : > { %2364 = vst.msk [vmem:[%s3631_s6 + $0xb8] sm:$0xff] %vm1048_vm0, %v1958_v38 }
 0x63a   : > { %v1913_v43 = vpop.trf.xlu0 }
 0x63b   : > { %v1959_v41 = vpop.trf.xlu1  ;;  %1929 = vst.msk [vmem:[%s3631_s6 + $0x50] sm:$0xff] %vm1048_vm0, %v1913_v43 }
 0x63c   : > { %2365 = vst.msk [vmem:[%s3631_s6 + $0xc0] sm:$0xff] %vm1048_vm0, %v1959_v41 }
 0x63e   : > { %v1914_v44 = vpop.trf.xlu0 }
 0x63f   : > { %v1960_v42 = vpop.trf.xlu1  ;;  %1930 = vst.msk [vmem:[%s3631_s6 + $0x58] sm:$0xff] %vm1048_vm0, %v1914_v44 }
 0x640   : > { %2366 = vst.msk [vmem:[%s3631_s6 + $0xc8] sm:$0xff] %vm1048_vm0, %v1960_v42 }
 0x642   : > { %v1915_v22 = vpop.trf.xlu0 }
 0x643   : > { %v1961_v60 = vpop.trf.xlu1  ;;  %1931 = vst.msk [vmem:[%s3631_s6 + $0x60] sm:$0xff] %vm1048_vm0, %v1915_v22 }
 0x644   : > { %2367 = vst.msk [vmem:[%s3631_s6 + $0xd0] sm:$0xff] %vm1048_vm0, %v1961_v60 }
 0x646   : > { %v1916_v46 = vpop.trf.xlu0 }
 0x647   : > { %v1962_v18 = vpop.trf.xlu1  ;;  %1932 = vst.msk [vmem:[%s3631_s6 + $0x68] sm:$0xff] %vm1048_vm0, %v1916_v46 }
 0x648   : > { %2368 = vst.msk [vmem:[%s3631_s6 + $0xd8] sm:$0xff] %vm1048_vm0, %v1962_v18 }
 0x64a   : > { %v1917_v48 = vpop.trf.xlu0 }
 0x64b   : > { %v1963_v45 = vpop.trf.xlu1  ;;  %1933 = vst.msk [vmem:[%s3631_s6 + $0x70] sm:$0xff] %vm1048_vm0, %v1917_v48 }
 0x64c   : > { %2369 = vst.msk [vmem:[%s3631_s6 + $0xe0] sm:$0xff] %vm1048_vm0, %v1963_v45 }
 0x64e   : > { %v1918_v23 = vpop.trf.xlu0 }
 0x64f   : > { %v1964_v47 = vpop.trf.xlu1  ;;  %1934 = vst.msk [vmem:[%s3631_s6 + $0x78] sm:$0xff] %vm1048_vm0, %v1918_v23 }
 0x650   : > { %2370 = vst.msk [vmem:[%s3631_s6 + $0xe8] sm:$0xff] %vm1048_vm0, %v1964_v47 }
 0x653   : > { %v1965_v49 = vpop.trf.xlu1 }
 0x654   : > { %2371 = vst.msk [vmem:[%s3631_s6 + $0xf0] sm:$0xff] %vm1048_vm0, %v1965_v49 }
 0x657   : > { %v1966_v61 = vpop.trf.xlu1 }
 0x658   : > { %2372 = vst.msk [vmem:[%s3631_s6 + $0xf8] sm:$0xff] %vm1048_vm0, %v1966_v61 }
 0x671   : > { %v1826_v50 = vpop.f32.mrb[0].mxu0 }
 0x672   : > { %v1838_v63 = vpop.f32.mrb[0].mxu1  ;;  %v1828_v26 = vpop.f32.mrb[1].mxu0 }
 0x673   : > { %v1840_v3 = vpop.f32.mrb[1].mxu1 }
 0x675   : > { %v1832_v8 = vpop.f32.mrb[2].mxu0 }
 0x676   : > { %v1844_v52 = vpop.f32.mrb[2].mxu1  ;;  %v1849_v53 = vmax.f32 %v1826_v50, %v1832_v8  ;;  %v1834_v55 = vpop.f32.mrb[3].mxu0 }
 0x677   : > { %v1856_v54 = vmax.f32 %v1838_v63, %v1844_v52  ;;  %v1846_v27 = vpop.f32.mrb[3].mxu1 }
 0x678   : > { %v1850_v57 = vrot.slane %v1849_v53, 4 }
 0x679   : > { %v1857_v62 = vrot.slane %v1856_v54, 4 }
 0x67a   : > { %v1851_v1 = vmax.f32 %v1849_v53, %v1850_v57 }
 0x67b   : > { %v1858_v2 = vmax.f32 %v1856_v54, %v1857_v62 }
 0x67c   : > { %v1852_v4 = vrot.slane %v1851_v1, 2 }
 0x67d   : > { %v1859_v5 = vrot.slane %v1858_v2, 2 }
 0x67e   : > { %v1853_v6 = vmax.f32 %v1851_v1, %v1852_v4 }
 0x67f   : > { %v1860_v7 = vmax.f32 %v1858_v2, %v1859_v5 }
 0x680   : > { %v1854_v9 = vrot.slane %v1853_v6, 1 }
 0x681   : > { %v1861_v10 = vrot.slane %v1860_v7, 1 }
 0x682   : > { %v1855_v12 = vmax.f32 %v1853_v6, %v1854_v9 }
 0x683   : > { %v1862_v13 = vmax.f32 %v1860_v7, %v1861_v10 }
 0x684   : > { %v1863_v59 = vsub.f32 %v1826_v50, %v1855_v12  ;;  %v1864_v11 = vsub.f32 %v1832_v8, %v1855_v12 }
 0x685   : > { %v1865_v51 = vsub.f32 %v1838_v63, %v1862_v13  ;;  %v1866_v15 = vsub.f32 %v1844_v52, %v1862_v13 }
 0x686   : > { %v1867_v16 = vmul.f32 1.442695, %v1863_v59  ;;  %v1869_v56 = vmul.f32 1.442695, %v1864_v11 }
 0x687   : > { %v1871_v0 = vmul.f32 1.442695, %v1865_v51  ;;  %v1873_v19 = vmul.f32 1.442695, %v1866_v15 }
 0x688   : > { %2882 = vpow2.f32 %v1867_v16 }
 0x689   : > { %2884 = vpow2.f32 %v1869_v56 }
 0x68a   : > { %2886 = vpow2.f32 %v1871_v0 }
 0x68b   : > { %2888 = vpow2.f32 %v1873_v19 }
 0x692   : > { %v2883_v14 = vpop.eup %2882 }
 0x693   : > { %v2885_v20 = vpop.eup %2884  ;;  %v1875_v21 = vmul.f32 %v2883_v14, %v1828_v26  ;;  %1880 = vst [vmem:[%s3633_s0 + $0x8] sm:$0xff] %v2883_v14 }
 0x694   : > { %v2887_v24 = vpop.eup %2886  ;;  %1882 = vst [vmem:[%s3633_s0 + $0x18] sm:$0xff] %v2885_v20  ;;  %v1876_v28 = vmul.f32 %v2885_v20, %v1834_v55 }
 0x695   : > { %v2889_v29 = vpop.eup %2888  ;;  %1879 = vst [vmem:[%s3633_s0] sm:$0xff] %v1875_v21  ;;  %v1877_v25 = vmul.f32 %v2887_v24, %v1840_v3  ;;  %1884 = vst [vmem:[%s3633_s0 + $0x28] sm:$0xff] %v2887_v24 }
 0x696   : > { %1886 = vst [vmem:[%s3633_s0 + $0x38] sm:$0xff] %v2889_v29  ;;  %1881 = vst [vmem:[%s3633_s0 + $0x10] sm:$0xff] %v1876_v28  ;;  %v1878_v30 = vmul.f32 %v2889_v29, %v1846_v27 }
 0x697   : > { %1883 = vst [vmem:[%s3633_s0 + $0x20] sm:$0xff] %v1877_v25 }
 0x698   : > { %1885 = vst [vmem:[%s3633_s0 + $0x30] sm:$0xff] %v1878_v30 }
 0x699 PF: > { %s4211_s19 = sld [smem:[#allocation36_spill]]  ;;  %s4212_s24 = sld [smem:[#allocation34_spill]] }
 0x69a   : > { %s2388_s25 = sshll.u32 %s3177_s20, 10  ;;  %s4213_s4 = sld [smem:[#allocation50_spill]] }
 0x69b   : > { %s2032_s10 = sshll.u32 %s3633_s0, 4  ;;  %s3206_s7 = smov [#allocation13]   ;;  %s4006_s10 = int_to_ptr.vmem [resolvable:$true] %s2032_s10 }
 0x69c   : > { %s3023_s15 = scalar_lea.vmem %s4006_s10, 1024  ;;  %s3027_s12 = sshll.u32 %s3206_s7, 4  ;;  %s3028_s12 = int_to_ptr.vmem [resolvable:$false] %s3027_s12 }
 0x69d   : > { %p3024_p3 = scmp.ne.s32.totalorder %s4006_s10, %s3023_s15  ;;  %s3029_s1 = scalar_lea.vmem %s3028_s12, 2048 }
 0x69e   : > { %p3030_p9 = scmp.lt.s32.totalorder %s4006_s10, %s3028_s12  ;;  %p3031_p13 = scmp.lt.s32.totalorder %s3029_s1, %s3023_s15 }
 0x69f   : > { %s2009_s29 = scalar_lea.sflag [#allocation5], %s4211_s19  ;;  %p4214_p0 = scmp.ne.s32.totalorder %s4212_s24, 0 }
 0x6a0   : > { %s4003_s18 = scalar_lea.hbm %s4213_s4, %s2388_s25  ;;  %p3032_p1 = por %p3031_p13, %p3030_p9 }
 0x6a1   : > { %p3025_p8 = pnand %p3024_p3, %p4214_p0 }
 0x6a3   : > { %p3026_p12 = pneg %p3025_p8 }
 0x6a5   : > { %p3033_p10 = pnand %p3032_p1, %p3026_p12 }
 0x6a7   : > { %3036 = shalt.err (!%p3033_p10)
}
 0x6a8   : > { %s3037_s6 = scalar_lea.hbm %s4003_s18, 1024  ;;  %s3041_s9 = scalar_lea.hbm %s4213_s4, 2048 }
 0x6a9   : > { %p3038_p7 = scmp.ne.s32.totalorder %s4003_s18, %s3037_s6  ;;  %p3042_p11 = scmp.lt.u32.totalorder %s4003_s18, %s4213_s4 }
 0x6aa   : > { %p3043_p5 = scmp.lt.u32.totalorder %s3041_s9, %s3037_s6  ;;  %p3045_p3 = scmp.lt.u32.totalorder %s3037_s6, %s4003_s18 }
 0x6ab   : > { %p3039_p4 = pnand %p3038_p7, %p4214_p0 }
 0x6ac   : > { %p3044_p6 = por %p3043_p5, %p3042_p11 }
 0x6ad   : > { %p3040_p2 = pneg %p3039_p4 }
 0x6ae   : > { %p3046_p8 = por %p3045_p3, %p3044_p6 }
 0x6b0   : > { %p3047_p12 = pnand %p3046_p8, %p3040_p2 }
 0x6b2   : > { %3050 = shalt.err (!%p3047_p12)
}
 0x6b3   : > { %s3207_s21 = smov 256   ;;  %s3208_s23 = smov 16  }
 0x6b4   : > { %2693 = dma.vmem_to_hbm [thread:$0]  (%p4214_p0), %s4006_s10, 1024, %s4003_s18, %s2009_s29, %s3207_s21, %s3207_s21, %s3208_s23  }
 0x6b5   : > { %s2389_s16 = sshll.u32 %s3177_s20, 5  ;;  %s2048_s3 = sshll.u32 %s3635_s13, 4  ;;  %s4040_s3 = int_to_ptr.vmem [resolvable:$true] %s2048_s3 }
 0x6b6   : > { %s4215_s11 = sld [smem:[#allocation51_spill]]  ;;  %s2014_s27 = scalar_lea.sflag [#allocation15], %s4211_s19 }
 0x6b7   : > { %s3051_s25 = scalar_lea.vmem %s4040_s3, 32  ;;  %s3209_s22 = smov [#allocation14]  }
 0x6b8   : > { %p3052_p9 = scmp.ne.s32.totalorder %s4040_s3, %s3051_s25  ;;  %s3055_s2 = sshll.u32 %s3209_s22, 4  ;;  %s3056_s2 = int_to_ptr.vmem [resolvable:$false] %s3055_s2 }
 0x6b9   : > { %s3057_s20 = scalar_lea.vmem %s3056_s2, 64  ;;  %p3058_p10 = scmp.lt.s32.totalorder %s4040_s3, %s3056_s2 }
 0x6ba   : > { %p3053_p13 = pnand %p3052_p9, %p4214_p0  ;;  %p3059_p7 = scmp.lt.s32.totalorder %s3057_s20, %s3051_s25 }
 0x6bc   : > { %s4038_s28 = scalar_lea.hbm %s4215_s11, %s2389_s16  ;;  %p3054_p1 = pneg %p3053_p13 }
 0x6bd   : > { %p3060_p4 = por %p3059_p7, %p3058_p10 }
 0x6bf   : > { %p3061_p2 = pnand %p3060_p4, %p3054_p1 }
 0x6c1   : > { %3064 = shalt.err (!%p3061_p2)
}
 0x6c2   : > { %s3065_s13 = scalar_lea.hbm %s4038_s28, 32  ;;  %s3069_s29 = scalar_lea.hbm %s4215_s11, 64 }
 0x6c3   : > { %p3066_p11 = scmp.ne.s32.totalorder %s4038_s28, %s3065_s13  ;;  %p3070_p3 = scmp.lt.u32.totalorder %s4038_s28, %s4215_s11 }
 0x6c4   : > { %p3071_p8 = scmp.lt.u32.totalorder %s3069_s29, %s3065_s13  ;;  %p3073_p9 = scmp.lt.u32.totalorder %s3065_s13, %s4038_s28 }
 0x6c5   : > { %p3067_p5 = pnand %p3066_p11, %p4214_p0 }
 0x6c6   : > { %p3072_p12 = por %p3071_p8, %p3070_p3 }
 0x6c7   : > { %p3068_p6 = pneg %p3067_p5 }
 0x6c8   : > { %p3074_p13 = por %p3073_p9, %p3072_p12 }
 0x6ca   : > { %p3075_p1 = pnand %p3074_p13, %p3068_p6 }
 0x6cc   : > { %3078 = shalt.err (!%p3075_p1)
}
 0x6cd   : > { %s3210_s12 = smov 1  }
 0x6ce   : > { %2694 = dma.vmem_to_hbm [thread:$0]  (%p4214_p0), %s4040_s3, 32, %s4038_s28, %s2014_s27, %s3208_s23, %s3208_s23, %s3210_s12  }
 0x6cf PF: > { %s4216_s1 = sld [smem:[#allocation29_spill]]  ;;  %s4217_s6 = sld [smem:[#allocation22_spill]] }
 0x6d0   : > { %s4218_s0 = sld [smem:[#allocation35_spill]] }
 0x6d5   : > { %p2726_p10 = scmp.ge.s32.totalorder %s4216_s1, 2  ;;  %s2072_s5 = sand.u32 1, %s4217_s6  }
 0x6d6   : > { %p4219_p7 = scmp.ne.s32.totalorder %s4218_s0, 0  ;;  %s2073_s9 = scalar_lea.sflag [#allocation5], %s2072_s5 }
 0x6d8   : > { %p2715_p4 = pnand %p2726_p10, %p4219_p7 }
 0x6da   : > { %3140 = dma.done.wait (!%p2715_p4), %s2073_s9, 1024  }
 0x6db   : > { %3142 = vsyncadd (!%p2715_p4), %s2073_s9, 4294966272  ;;  %s2082_s30 = scalar_lea.sflag [#allocation15], %s2072_s5 }
 0x6dc   : > { %3144 = dma.done.wait (!%p2715_p4), %s2082_s30, 32  }
 0x6dd   : > { %3146 = vsyncadd (!%p2715_p4), %s2082_s30, 4294967264  ;;  %s39_s23 = sadd.s32 1, %s4216_s1   ;;  %s4220_s29 = sld [smem:[#allocation23_spill]] }
 0x6de   : > { %p36_p2 = scmp.ge.s32.totalorder %s39_s23, 6   ;;  %s4221_s30 = sld [smem:[#allocation24_spill]] }
 0x6df   : > { %s4222_s15 = sld [smem:[#allocation33_spill]]  ;;  %s4223_s16 = sld [smem:[#allocation25_spill]] }
 0x6e0   : > { %s4224_s17 = sld [smem:[#allocation26_spill]]  ;;  %s4225_s18 = sld [smem:[#allocation32_spill]] }
 0x6e1   : > { %s4226_s19 = sld [smem:[#allocation27_spill]]  ;;  %s4227_s20 = sld [smem:[#allocation28_spill]] }
 0x6e2   : > { %s4228_s21 = sld [smem:[#allocation30_spill]]  ;;  %s4229_s22 = sld [smem:[#allocation31_spill]] }
 0x6e3   :  { %38 = sbr.rel (!%p36_p2) target bundleno = 31 (0x1f), region = 199 }
 0x6ea   :  { %2087 = vsyncpa [#allocation4], 1 }
 0x6eb   :  { %2089 = vsyncpa [#allocation4 + $0x1], 1 }
 0x6ec   :  { %2090 = vsyncpa [#allocation9], 1 }
 0x6ed   :  { %2092 = vsyncpa [#allocation9 + $0x1], 1 }
 0x6ee   :  { %2093 = vsyncpa [#allocation12], 1 }
 0x6ef   :  { %2094 = vsyncpa [#allocation5], 1 }
 0x6f0   :  { %2096 = vsyncpa [#allocation5 + $0x1], 1 }
 0x6f1   :  { %2097 = vsyncpa [#allocation15], 1 }
 0x6f2   :  { %2099 = vsyncpa [#allocation15 + $0x1], 1 }
 0x6f3   :  { %2100 = vsyncpa [#allocation6], 1 }
 0x6f4   :  { %2102 = vsyncpa [#allocation6 + $0x1], 1 }

</bundles_post_ra>
